<compile_context>
chip_gen: v6e
topology: v6e:2x2x1
jax: 0.10.0
libtpu: 0.0.40
codegen_flags: <defaults>
</compile_context>

<pallas_src>
import functools

import numpy as np
import jax
import jax.numpy as jnp
from jax import lax
from jax.experimental import pallas as pl
from jax.experimental.pallas import tpu as pltpu

_DATA_RANGE = 1.0                      # matches ssim(..., data_range=1.0)
_VMEM_LIMIT = 32 * 1024 * 1024         # safe scoped-VMEM budget on v5e/v6e/v7x


# ----------------------------------------------------------------------------
# helpers
# ----------------------------------------------------------------------------
def _write_scalar_pair(o_ref, v0, v1):
    """Write two scalar partial sums into a lane-dense (1, 8, 128) block."""
    sub = lax.broadcasted_iota(jnp.int32, o_ref.shape, 1)
    lane = lax.broadcasted_iota(jnp.int32, o_ref.shape, 2)
    o_ref[...] = jnp.where((sub == 0) & (lane == 0), v0,
                           jnp.where((sub == 0) & (lane == 1), v1, 0.0))


def _gaussian_band(size, win, sigma):
    # TODO(synk): for large H/W replace this O(size^2) banded matrix with a
    # separable 11-tap blur (pltpu.roll + weighted adds) to bound VMEM.
    coords = np.arange(win, dtype=np.float64) - (win - 1) / 2.0
    g = np.exp(-(coords ** 2) / (2.0 * sigma ** 2))
    g /= g.sum()
    out = size - win + 1
    band = np.zeros((out, size), dtype=np.float32)
    for i in range(out):
        band[i, i:i + win] = g
    return band


def _conv3x3_pad_masks(h, w):
    """mask[tap, m] = 1 iff the (pad=1) 3x3 tap source pixel is in-bounds."""
    hh, ww = np.meshgrid(np.arange(h), np.arange(w), indexing="ij")
    m = np.zeros((9, h * w), dtype=np.float32)
    for dh in range(3):
        for dw in range(3):
            valid = ((hh + dh - 1 >= 0) & (hh + dh - 1 < h) &
                     (ww + dw - 1 >= 0) & (ww + dw - 1 < w))
            m[dh * 3 + dw] = valid.reshape(-1).astype(np.float32)
    return m


def _pick_slab_batch(nc, h, w, budget_bytes=8 * 1024 * 1024):
    # 2 inputs x 2 pipeline buffers + stacked blur operands + intermediates.
    per_slab = (2 * 2 + 12) * h * w * 4
    cap = int(max(1, min(nc, budget_bytes // max(per_slab, 1))))
    for cand in range(cap, 0, -1):
        if nc % cand == 0:
            return cand
    return 1


# ----------------------------------------------------------------------------
# Kernel 1: fused MSE partial-sum + batched 11x11-gaussian SSIM partial-sum
#           (one HBM pass over pred/target tiles; grid over slab batches)
# ----------------------------------------------------------------------------
def _mse_ssim_kernel(x_ref, y_ref, gh_ref, gwt_ref, o_ref, *, c1, c2):
    x = x_ref[...]                         # (B, H, W)
    y = y_ref[...]
    b, h, w = x.shape
    ho = gh_ref.shape[0]
    wo = gwt_ref.shape[1]

    # MSE partial (shares the tile with SSIM -> no extra HBM pass).
    diff = x - y
    sse = jnp.sum(diff * diff)

    # Stack the five SSIM blur operands along the batch axis so the separable
    # gaussian blur runs as ONE pair of batched matmuls (instead of 10 tiny
    # per-operand matmuls); the gh / gwt broadcasts are hoisted once.
    stack = jnp.concatenate([x, y, x * x, y * y, x * y], axis=0)   # (5B,H,W)
    ghb = jnp.broadcast_to(gh_ref[...][None], (5 * b, ho, h))
    gwb = jnp.broadcast_to(gwt_ref[...][None], (5 * b, w, wo))
    t = jnp.einsum("boh,bhw->bow", ghb, stack,
                   preferred_element_type=jnp.float32)             # (5B,HO,W)
    blurred = jnp.einsum("bow,bwp->bop", t, gwb,
                         preferred_element_type=jnp.float32)       # (5B,HO,WO)

    mu1 = blurred[0 * b:1 * b]
    mu2 = blurred[1 * b:2 * b]
    ex2 = blurred[2 * b:3 * b]
    ey2 = blurred[3 * b:4 * b]
    exy = blurred[4 * b:5 * b]

    mu11 = mu1 * mu1
    mu22 = mu2 * mu2
    mu12 = mu1 * mu2
    s11 = ex2 - mu11
    s22 = ey2 - mu22
    s12 = exy - mu12
    num = (2.0 * mu12 + c1) * (2.0 * s12 + c2)
    den = (mu11 + mu22 + c1) * (s11 + s22 + c2)
    # divide -> EUP reciprocal slot (frees VALU issue slots)
    ssim_sum = jnp.sum(num * pl.reciprocal(den, approx=True))

    _write_scalar_pair(o_ref, sse, ssim_sum)


def pallas_mse_ssim(pred, target, win_size=11, sigma=1.5):
    n, c, h, w = pred.shape
    nc = n * c
    ho, wo = h - win_size + 1, w - win_size + 1
    x = pred.reshape(nc, h, w).astype(jnp.float32)
    y = target.reshape(nc, h, w).astype(jnp.float32)
    gh = jnp.asarray(_gaussian_band(h, win_size, sigma))        # (HO, H)
    gwt = jnp.asarray(_gaussian_band(w, win_size, sigma).T)     # (W, WO)
    b = _pick_slab_batch(nc, h, w)
    nblk = nc // b
    c1 = float((0.01 * _DATA_RANGE) ** 2)
    c2 = float((0.03 * _DATA_RANGE) ** 2)

    partials = pl.pallas_call(
        functools.partial(_mse_ssim_kernel, c1=c1, c2=c2),
        grid=(nblk,),
        in_specs=[
            pl.BlockSpec((b, h, w), lambda i: (i, 0, 0)),
            pl.BlockSpec((b, h, w), lambda i: (i, 0, 0)),
            pl.BlockSpec((ho, h), lambda i: (0, 0)),
            pl.BlockSpec((w, wo), lambda i: (0, 0)),
        ],
        out_specs=pl.BlockSpec((1, 8, 128), lambda i: (i, 0, 0)),
        out_shape=jax.ShapeDtypeStruct((nblk, 8, 128), jnp.float32),
        compiler_params=pltpu.CompilerParams(
            dimension_semantics=("parallel",),
            vmem_limit_bytes=_VMEM_LIMIT),
    )(x, y, gh, gwt)

    sse = jnp.sum(partials[:, 0, 0])
    ssim_sum = jnp.sum(partials[:, 0, 1])
    mse = sse / (n * c * h * w)
    ssim_mean = ssim_sum / (nc * ho * wo)
    return mse, ssim_mean


# ----------------------------------------------------------------------------
# Kernel 2: fused conv3x3+ReLU features (in-VMEM im2col, no HBM expansion)
#           + content-MSE partial + Gram-matrix style-MSE partial, per sample.
# ----------------------------------------------------------------------------
def _vgg_feat_loss_kernel(xp_ref, xt_ref, w_ref, m_ref, o_ref, patches_ref,
                          *, H, W, inv_norm):
    wm = w_ref[...]                        # (F, 9C), column order tap*C + c
    masks = m_ref[...]                     # (9, HW)

    def features(xflat):                   # xflat: (C, HW)
        cdim = xflat.shape[0]
        # Build the (9C, HW) im2col patch matrix in VMEM scratch: per tap a
        # rolled+masked copy of the flattened image (zero padding via mask).
        for dh in range(3):
            for dw in range(3):
                tap = dh * 3 + dw
                off = (dh - 1) * W + (dw - 1)
                shifted = xflat if off == 0 else jnp.roll(xflat, -off, axis=1)
                patches_ref[tap * cdim:(tap + 1) * cdim, :] = (
                    shifted * masks[tap:tap + 1, :])
        # Single K=36 MXU matmul, lane-dense N = H*W output.
        f = jnp.dot(wm, patches_ref[...], preferred_element_type=jnp.float32)
        return jnp.maximum(f, 0.0)         # (F, HW)

    fp = features(xp_ref[0])
    ft = features(xt_ref[0])

    # content (feature MSE) partial
    d = fp - ft
    content_sse = jnp.sum(d * d)

    # style (Gram MSE) partial — Grams stay in VMEM, never written to HBM.
    gp = lax.dot_general(fp, fp, (((1,), (1,)), ((), ())),
                         preferred_element_type=jnp.float32)
    gt = lax.dot_general(ft, ft, (((1,), (1,)), ((), ())),
                         preferred_element_type=jnp.float32)
    dg = (gp - gt) * inv_norm
    style_sse = jnp.sum(dg * dg)

    _write_scalar_pair(o_ref, content_sse, style_sse)


def pallas_vgg_content_style(pred, target, weight):
    n, c, h, w = pred.shape
    f = weight.shape[0]
    hw = h * w
    xf = pred.reshape(n, c, hw).astype(jnp.float32)
    yf = target.reshape(n, c, hw).astype(jnp.float32)
    # (F, C, 3, 3) -> (F, 9*C) with column order tap*C + c, tap = dh*3+dw
    wm = weight.transpose(0, 2, 3, 1).reshape(f, 9 * c).astype(jnp.float32)
    masks = jnp.asarray(_conv3x3_pad_masks(h, w))
    inv_norm = 1.0 / float(f * h * w)

    # TODO(synk): for large H*W, additionally tile the HW axis (K of the Gram)
    # with an f32 accumulator to bound the per-sample VMEM block.
    partials = pl.pallas_call(
        functools.partial(_vgg_feat_loss_kernel, H=h, W=w, inv_norm=inv_norm),
        grid=(n,),
        in_specs=[
            pl.BlockSpec((1, c, hw), lambda i: (i, 0, 0)),
            pl.BlockSpec((1, c, hw), lambda i: (i, 0, 0)),
            pl.BlockSpec((f, 9 * c), lambda i: (0, 0)),
            pl.BlockSpec((9, hw), lambda i: (0, 0)),
        ],
        out_specs=pl.BlockSpec((1, 8, 128), lambda i: (i, 0, 0)),
        out_shape=jax.ShapeDtypeStruct((n, 8, 128), jnp.float32),
        scratch_shapes=[pltpu.VMEM((9 * c, hw), jnp.float32)],
        compiler_params=pltpu.CompilerParams(
            dimension_semantics=("parallel",),
            vmem_limit_bytes=_VMEM_LIMIT),
    )(xf, yf, wm, masks)

    content = jnp.sum(partials[:, 0, 0]) / (n * f * h * w)
    style = jnp.sum(partials[:, 0, 1]) / (n * f * f)
    return content, style


# ----------------------------------------------------------------------------
# VGG-style perceptual loss (content = feature MSE, style = Gram MSE)
# ----------------------------------------------------------------------------
class VGGLossPallas:
    # TODO(synk): the original VGGLoss uses pretrained VGG-19 feature slices
    # (torchvision checkpoint, not available here); we use a deterministically
    # initialized conv3x3+ReLU feature extractor with the standard content
    # (feature MSE) / style (Gram MSE) formulation.
    def __init__(self, in_channels=4, feature_dim=16, seed=42):
        key = jax.random.PRNGKey(seed)
        fan_in = in_channels * 9
        self.weight = (jax.random.normal(
            key, (feature_dim, in_channels, 3, 3), jnp.float32)
            * np.sqrt(2.0 / fan_in))

    def __call__(self, pred, target):
        return pallas_vgg_content_style(pred, target, self.weight)


class VITLossPallas:
    def __init__(self, alpha=0.84, vgg_weight=0.1, content_weight=0.5,
                 style_weight=0.5, in_channels=4):
        self.alpha = alpha
        self.vgg_weight = vgg_weight
        self.content_weight = content_weight
        self.style_weight = style_weight
        self.vgg_loss = VGGLossPallas(in_channels=in_channels)
        # jit the whole loss: no host syncs between the two pallas_calls and
        # XLA fuses the surrounding reshapes / partial-sum reductions.
        self._forward = jax.jit(self._loss)

    def _loss(self, pred, target):
        mse_loss, ssim_mean = pallas_mse_ssim(pred, target)
        ssim_loss = 1.0 - ssim_mean
        content_loss, style_loss = self.vgg_loss(pred, target)
        vgg_loss = (self.content_weight * content_loss
                    + self.style_weight * style_loss)
        total_loss = (self.alpha * mse_loss
                      + (1.0 - self.alpha) * ssim_loss
                      + self.vgg_weight * vgg_loss)
        return total_loss, mse_loss, ssim_loss, vgg_loss

    def __call__(self, pred, target):
        # TODO(synk): torch returns (tensor, .item(), .item(), .item()); we
        # return jnp scalars so the whole loss stays jittable (no host syncs).
        return self._forward(pred, target)


if __name__ == "__main__":
    key = jax.random.PRNGKey(0)
    k1, k2 = jax.random.split(key)
    pred = jax.random.uniform(k1, (2, 4, 16, 16), dtype=jnp.float32)
    target = jax.random.uniform(k2, (2, 4, 16, 16), dtype=jnp.float32)

    loss_fn = VITLossPallas(in_channels=4)
    total, mse_v, ssim_v, vgg_v = loss_fn(pred, target)
    jax.block_until_ready(total)
    print("KERNEL_OK")
</pallas_src>

<mosaic_0001>
module attributes {stable_mosaic.version = 11 : i64} {
  func.func @_mse_ssim_kernel(%arg0: i32, %arg1: memref<8x16x16xf32, #tpu.memory_space<vmem>>, %arg2: memref<8x16x16xf32, #tpu.memory_space<vmem>>, %arg3: memref<6x16xf32, #tpu.memory_space<vmem>>, %arg4: memref<16x6xf32, #tpu.memory_space<vmem>>, %arg5: memref<1x8x128xf32, #tpu.memory_space<vmem>>) attributes {dimension_semantics = [#tpu.dimension_semantics<parallel>], iteration_bounds = array<i64: 1>, scalar_prefetch = 0 : i64, scratch_operands = 0 : i64, tpu.core_type = #tpu.core_type<tc>, window_params = [{transform_indices = @transform_0, window_bounds = array<i64: 8, 16, 16>}, {transform_indices = @transform_1, window_bounds = array<i64: 8, 16, 16>}, {pipeline_mode = #tpu.pipeline_mode<synchronous>, transform_indices = @transform_2, window_bounds = array<i64: 6, 16>}, {pipeline_mode = #tpu.pipeline_mode<synchronous>, transform_indices = @transform_3, window_bounds = array<i64: 16, 6>}, {transform_indices = @transform_4, window_bounds = array<i64: 1, 8, 128>}]} {
    %c0 = arith.constant 0 : index
    %c0_0 = arith.constant 0 : index
    %c0_1 = arith.constant 0 : index
    %0 = vector.load %arg1[%c0, %c0_0, %c0_1] : memref<8x16x16xf32, #tpu.memory_space<vmem>>, vector<8x16x16xf32>
    %c0_2 = arith.constant 0 : index
    %c0_3 = arith.constant 0 : index
    %c0_4 = arith.constant 0 : index
    %1 = vector.load %arg2[%c0_2, %c0_3, %c0_4] : memref<8x16x16xf32, #tpu.memory_space<vmem>>, vector<8x16x16xf32>
    %2 = arith.subf %0, %1 : vector<8x16x16xf32>
    %3 = arith.mulf %2, %2 : vector<8x16x16xf32>
    %4 = vector.shape_cast %3 : vector<8x16x16xf32> to vector<1x8x16x16xf32>
    %cst = arith.constant dense<0.000000e+00> : vector<1xf32>
    %5 = vector.multi_reduction <add>, %4, %cst [1, 2, 3] : vector<1x8x16x16xf32> to vector<1xf32>
    %6 = vector.shape_cast %5 : vector<1xf32> to vector<1x1x1x1xf32>
    %7 = vector.extract %6[0, 0, 0, 0] : f32 from vector<1x1x1x1xf32>
    %8 = arith.mulf %0, %0 : vector<8x16x16xf32>
    %9 = arith.mulf %1, %1 : vector<8x16x16xf32>
    %10 = arith.mulf %0, %1 : vector<8x16x16xf32>
    %11 = tpu.concatenate %0, %1, %8, %9, %10 in 0 : vector<8x16x16xf32>, vector<8x16x16xf32>, vector<8x16x16xf32>, vector<8x16x16xf32>, vector<8x16x16xf32> -> vector<40x16x16xf32>
    %c0_5 = arith.constant 0 : index
    %c0_6 = arith.constant 0 : index
    %12 = vector.load %arg3[%c0_5, %c0_6] : memref<6x16xf32, #tpu.memory_space<vmem>>, vector<6x16xf32>
    %13 = vector.shape_cast %12 : vector<6x16xf32> to vector<1x6x16xf32>
    %14 = vector.shape_cast %13 : vector<1x6x16xf32> to vector<1x6x16xf32>
    %15 = vector.broadcast %14 : vector<1x6x16xf32> to vector<40x6x16xf32>
    %c0_7 = arith.constant 0 : index
    %c0_8 = arith.constant 0 : index
    %16 = vector.load %arg4[%c0_7, %c0_8] : memref<16x6xf32, #tpu.memory_space<vmem>>, vector<16x6xf32>
    %17 = vector.shape_cast %16 : vector<16x6xf32> to vector<1x16x6xf32>
    %18 = vector.shape_cast %17 : vector<1x16x6xf32> to vector<1x16x6xf32>
    %19 = vector.broadcast %18 : vector<1x16x6xf32> to vector<40x16x6xf32>
    "tpu.trace_start"() <{level = 10 : i32, message = "boh,bhw->bow"}> : () -> ()
    %cst_9 = arith.constant dense<0.000000e+00> : vector<40x6x16xf32>
    %20 = tpu.matmul %15, %11, %cst_9 {dimension_numbers = #tpu.dot_dimension_numbers<[2], [1], [1], [2], [0, 0, 0, 1, 1, 2], [0], [0]>} : vector<40x6x16xf32>, vector<40x16x16xf32>, vector<40x6x16xf32> -> vector<40x6x16xf32>
    "tpu.trace_stop"() : () -> ()
    "tpu.trace_start"() <{level = 10 : i32, message = "bow,bwp->bop"}> : () -> ()
    %cst_10 = arith.constant dense<0.000000e+00> : vector<40x6x6xf32>
    %21 = tpu.matmul %20, %19, %cst_10 {dimension_numbers = #tpu.dot_dimension_numbers<[2], [1], [1], [2], [0, 0, 0, 1, 1, 2], [0], [0]>} : vector<40x6x16xf32>, vector<40x16x6xf32>, vector<40x6x6xf32> -> vector<40x6x6xf32>
    "tpu.trace_stop"() : () -> ()
    %22 = vector.extract_strided_slice %21 {offsets = [0, 0, 0], sizes = [8, 6, 6], strides = [1, 1, 1]} : vector<40x6x6xf32> to vector<8x6x6xf32>
    %23 = vector.extract_strided_slice %21 {offsets = [8, 0, 0], sizes = [8, 6, 6], strides = [1, 1, 1]} : vector<40x6x6xf32> to vector<8x6x6xf32>
    %24 = vector.extract_strided_slice %21 {offsets = [16, 0, 0], sizes = [8, 6, 6], strides = [1, 1, 1]} : vector<40x6x6xf32> to vector<8x6x6xf32>
    %25 = vector.extract_strided_slice %21 {offsets = [24, 0, 0], sizes = [8, 6, 6], strides = [1, 1, 1]} : vector<40x6x6xf32> to vector<8x6x6xf32>
    %26 = vector.extract_strided_slice %21 {offsets = [32, 0, 0], sizes = [8, 6, 6], strides = [1, 1, 1]} : vector<40x6x6xf32> to vector<8x6x6xf32>
    %27 = arith.mulf %22, %22 : vector<8x6x6xf32>
    %28 = arith.mulf %23, %23 : vector<8x6x6xf32>
    %29 = arith.mulf %22, %23 : vector<8x6x6xf32>
    %30 = arith.subf %24, %27 : vector<8x6x6xf32>
    %31 = arith.subf %25, %28 : vector<8x6x6xf32>
    %32 = arith.subf %26, %29 : vector<8x6x6xf32>
    %cst_11 = arith.constant 2.000000e+00 : f32
    %33 = vector.broadcast %cst_11 : f32 to vector<8x6x6xf32>
    %34 = arith.mulf %33, %29 : vector<8x6x6xf32>
    %cst_12 = arith.constant 9.99999974E-5 : f32
    %35 = vector.broadcast %cst_12 : f32 to vector<8x6x6xf32>
    %36 = arith.addf %34, %35 : vector<8x6x6xf32>
    %cst_13 = arith.constant 2.000000e+00 : f32
    %37 = vector.broadcast %cst_13 : f32 to vector<8x6x6xf32>
    %38 = arith.mulf %37, %32 : vector<8x6x6xf32>
    %cst_14 = arith.constant 8.99999984E-4 : f32
    %39 = vector.broadcast %cst_14 : f32 to vector<8x6x6xf32>
    %40 = arith.addf %38, %39 : vector<8x6x6xf32>
    %41 = arith.mulf %36, %40 : vector<8x6x6xf32>
    %42 = arith.addf %27, %28 : vector<8x6x6xf32>
    %cst_15 = arith.constant 9.99999974E-5 : f32
    %43 = vector.broadcast %cst_15 : f32 to vector<8x6x6xf32>
    %44 = arith.addf %42, %43 : vector<8x6x6xf32>
    %45 = arith.addf %30, %31 : vector<8x6x6xf32>
    %cst_16 = arith.constant 8.99999984E-4 : f32
    %46 = vector.broadcast %cst_16 : f32 to vector<8x6x6xf32>
    %47 = arith.addf %45, %46 : vector<8x6x6xf32>
    %48 = arith.mulf %44, %47 : vector<8x6x6xf32>
    %49 = tpu.reciprocal %48 {approx = true} : vector<8x6x6xf32> -> vector<8x6x6xf32>
    %50 = arith.mulf %41, %49 : vector<8x6x6xf32>
    %51 = vector.shape_cast %50 : vector<8x6x6xf32> to vector<1x8x6x6xf32>
    %cst_17 = arith.constant dense<0.000000e+00> : vector<1xf32>
    %52 = vector.multi_reduction <add>, %51, %cst_17 [1, 2, 3] : vector<1x8x6x6xf32> to vector<1xf32>
    %53 = vector.shape_cast %52 : vector<1xf32> to vector<1x1x1x1xf32>
    %54 = vector.extract %53[0, 0, 0, 0] : f32 from vector<1x1x1x1xf32>
    %55 = tpu.iota {dimensions = array<i32: 1>} : vector<1x8x128xi32>
    %56 = tpu.iota {dimensions = array<i32: 2>} : vector<1x8x128xi32>
    %c0_i32 = arith.constant 0 : i32
    %57 = vector.broadcast %c0_i32 : i32 to vector<1x8x128xi32>
    %58 = arith.cmpi eq, %55, %57 : vector<1x8x128xi32>
    %c0_i32_18 = arith.constant 0 : i32
    %59 = vector.broadcast %c0_i32_18 : i32 to vector<1x8x128xi32>
    %60 = arith.cmpi eq, %56, %59 : vector<1x8x128xi32>
    %61 = arith.andi %58, %60 : vector<1x8x128xi1>
    %c0_i32_19 = arith.constant 0 : i32
    %62 = vector.broadcast %c0_i32_19 : i32 to vector<1x8x128xi32>
    %63 = arith.cmpi eq, %55, %62 : vector<1x8x128xi32>
    %c1_i32 = arith.constant 1 : i32
    %64 = vector.broadcast %c1_i32 : i32 to vector<1x8x128xi32>
    %65 = arith.cmpi eq, %56, %64 : vector<1x8x128xi32>
    %66 = arith.andi %63, %65 : vector<1x8x128xi1>
    %cst_20 = arith.constant 0.000000e+00 : f32
    %67 = vector.broadcast %54 : f32 to vector<1x8x128xf32>
    %68 = vector.broadcast %cst_20 : f32 to vector<1x8x128xf32>
    %69 = arith.select %66, %67, %68 : vector<1x8x128xi1>, vector<1x8x128xf32>
    %70 = vector.broadcast %7 : f32 to vector<1x8x128xf32>
    %71 = arith.select %61, %70, %69 : vector<1x8x128xi1>, vector<1x8x128xf32>
    %c0_21 = arith.constant 0 : index
    %c0_22 = arith.constant 0 : index
    %c0_23 = arith.constant 0 : index
    %72 = vector.load %arg5[%c0_21, %c0_22, %c0_23] : memref<1x8x128xf32, #tpu.memory_space<vmem>>, vector<1x8x128xf32>
    tpu.vector_store %arg5[%c0_21, %c0_22, %c0_23], %71 {strides = array<i32>} : memref<1x8x128xf32, #tpu.memory_space<vmem>>, vector<1x8x128xf32>,
    return
  }
  func.func @transform_0(%arg0: i32) -> (i32, i32, i32) {
    %c0_i32 = arith.constant 0 : i32
    %c0_i32_0 = arith.constant 0 : i32
    %c0_i32_1 = arith.constant 0 : i32
    return %arg0, %c0_i32, %c0_i32_0 : i32, i32, i32
  }
  func.func @transform_1(%arg0: i32) -> (i32, i32, i32) {
    %c0_i32 = arith.constant 0 : i32
    %c0_i32_0 = arith.constant 0 : i32
    %c0_i32_1 = arith.constant 0 : i32
    return %arg0, %c0_i32, %c0_i32_0 : i32, i32, i32
  }
  func.func @transform_2(%arg0: i32) -> (i32, i32) {
    %c0_i32 = arith.constant 0 : i32
    %c0_i32_0 = arith.constant 0 : i32
    %c0_i32_1 = arith.constant 0 : i32
    return %c0_i32, %c0_i32_0 : i32, i32
  }
  func.func @transform_3(%arg0: i32) -> (i32, i32) {
    %c0_i32 = arith.constant 0 : i32
    %c0_i32_0 = arith.constant 0 : i32
    %c0_i32_1 = arith.constant 0 : i32
    return %c0_i32, %c0_i32_0 : i32, i32
  }
  func.func @transform_4(%arg0: i32) -> (i32, i32, i32) {
    %c0_i32 = arith.constant 0 : i32
    %c0_i32_0 = arith.constant 0 : i32
    %c0_i32_1 = arith.constant 0 : i32
    return %arg0, %c0_i32, %c0_i32_0 : i32, i32, i32
  }
}

module attributes {stable_mosaic.version = 11 : i64} {
  func.func @_vgg_feat_loss_kernel(%arg0: i32, %arg1: memref<1x4x256xf32, #tpu.memory_space<vmem>>, %arg2: memref<1x4x256xf32, #tpu.memory_space<vmem>>, %arg3: memref<16x36xf32, #tpu.memory_space<vmem>>, %arg4: memref<9x256xf32, #tpu.memory_space<vmem>>, %arg5: memref<1x8x128xf32, #tpu.memory_space<vmem>>, %arg6: memref<36x256xf32, #tpu.memory_space<vmem>>) attributes {dimension_semantics = [#tpu.dimension_semantics<parallel>], iteration_bounds = array<i64: 2>, scalar_prefetch = 0 : i64, scratch_operands = 1 : i64, tpu.core_type = #tpu.core_type<tc>, window_params = [{transform_indices = @transform_0, window_bounds = array<i64: 1, 4, 256>}, {transform_indices = @transform_1, window_bounds = array<i64: 1, 4, 256>}, {pipeline_mode = #tpu.pipeline_mode<synchronous>, transform_indices = @transform_2, window_bounds = array<i64: 16, 36>}, {pipeline_mode = #tpu.pipeline_mode<synchronous>, transform_indices = @transform_3, window_bounds = array<i64: 9, 256>}, {transform_indices = @transform_4, window_bounds = array<i64: 1, 8, 128>}]} {
    %c0 = arith.constant 0 : index
    %c0_0 = arith.constant 0 : index
    %0 = vector.load %arg3[%c0, %c0_0] : memref<16x36xf32, #tpu.memory_space<vmem>>, vector<16x36xf32>
    %c0_1 = arith.constant 0 : index
    %c0_2 = arith.constant 0 : index
    %1 = vector.load %arg4[%c0_1, %c0_2] : memref<9x256xf32, #tpu.memory_space<vmem>>, vector<9x256xf32>
    %c0_3 = arith.constant 0 : index
    %c0_4 = arith.constant 0 : index
    %c0_5 = arith.constant 0 : index
    %2 = vector.load %arg1[%c0_3, %c0_4, %c0_5] : memref<1x4x256xf32, #tpu.memory_space<vmem>>, vector<1x4x256xf32>
    %3 = vector.shape_cast %2 : vector<1x4x256xf32> to vector<4x256xf32>
    %4 = vector.extract_strided_slice %3 {offsets = [0, 239], sizes = [4, 17], strides = [1, 1]} : vector<4x256xf32> to vector<4x17xf32>
    %5 = vector.extract_strided_slice %3 {offsets = [0, 0], sizes = [4, 239], strides = [1, 1]} : vector<4x256xf32> to vector<4x239xf32>
    %6 = tpu.concatenate %4, %5 in 1 : vector<4x17xf32>, vector<4x239xf32> -> vector<4x256xf32>
    %7 = vector.extract_strided_slice %1 {offsets = [0, 0], sizes = [1, 256], strides = [1, 1]} : vector<9x256xf32> to vector<1x256xf32>
    %8 = vector.broadcast %7 : vector<1x256xf32> to vector<4x256xf32>
    %9 = arith.mulf %6, %8 : vector<4x256xf32>
    %c0_6 = arith.constant 0 : index
    %c0_7 = arith.constant 0 : index
    %10 = vector.load %arg6[%c0_6, %c0_7] : memref<36x256xf32, #tpu.memory_space<vmem>>, vector<4x256xf32>
    tpu.vector_store %arg6[%c0_6, %c0_7], %9 {strides = array<i32>} : memref<36x256xf32, #tpu.memory_space<vmem>>, vector<4x256xf32>,
    %11 = vector.extract_strided_slice %3 {offsets = [0, 240], sizes = [4, 16], strides = [1, 1]} : vector<4x256xf32> to vector<4x16xf32>
    %12 = vector.extract_strided_slice %3 {offsets = [0, 0], sizes = [4, 240], strides = [1, 1]} : vector<4x256xf32> to vector<4x240xf32>
    %13 = tpu.concatenate %11, %12 in 1 : vector<4x16xf32>, vector<4x240xf32> -> vector<4x256xf32>
    %14 = vector.extract_strided_slice %1 {offsets = [1, 0], sizes = [1, 256], strides = [1, 1]} : vector<9x256xf32> to vector<1x256xf32>
    %15 = vector.broadcast %14 : vector<1x256xf32> to vector<4x256xf32>
    %16 = arith.mulf %13, %15 : vector<4x256xf32>
    %c4 = arith.constant 4 : index
    %c0_8 = arith.constant 0 : index
    %17 = vector.load %arg6[%c4, %c0_8] : memref<36x256xf32, #tpu.memory_space<vmem>>, vector<4x256xf32>
    tpu.vector_store %arg6[%c4, %c0_8], %16 {strides = array<i32>} : memref<36x256xf32, #tpu.memory_space<vmem>>, vector<4x256xf32>,
    %18 = vector.extract_strided_slice %3 {offsets = [0, 241], sizes = [4, 15], strides = [1, 1]} : vector<4x256xf32> to vector<4x15xf32>
    %19 = vector.extract_strided_slice %3 {offsets = [0, 0], sizes = [4, 241], strides = [1, 1]} : vector<4x256xf32> to vector<4x241xf32>
    %20 = tpu.concatenate %18, %19 in 1 : vector<4x15xf32>, vector<4x241xf32> -> vector<4x256xf32>
    %21 = vector.extract_strided_slice %1 {offsets = [2, 0], sizes = [1, 256], strides = [1, 1]} : vector<9x256xf32> to vector<1x256xf32>
    %22 = vector.broadcast %21 : vector<1x256xf32> to vector<4x256xf32>
    %23 = arith.mulf %20, %22 : vector<4x256xf32>
    %c8 = arith.constant 8 : index
    %c0_9 = arith.constant 0 : index
    %24 = vector.load %arg6[%c8, %c0_9] : memref<36x256xf32, #tpu.memory_space<vmem>>, vector<4x256xf32>
    tpu.vector_store %arg6[%c8, %c0_9], %23 {strides = array<i32>} : memref<36x256xf32, #tpu.memory_space<vmem>>, vector<4x256xf32>,
    %25 = vector.extract_strided_slice %3 {offsets = [0, 255], sizes = [4, 1], strides = [1, 1]} : vector<4x256xf32> to vector<4x1xf32>
    %26 = vector.extract_strided_slice %3 {offsets = [0, 0], sizes = [4, 255], strides = [1, 1]} : vector<4x256xf32> to vector<4x255xf32>
    %27 = tpu.concatenate %25, %26 in 1 : vector<4x1xf32>, vector<4x255xf32> -> vector<4x256xf32>
    %28 = vector.extract_strided_slice %1 {offsets = [3, 0], sizes = [1, 256], strides = [1, 1]} : vector<9x256xf32> to vector<1x256xf32>
    %29 = vector.broadcast %28 : vector<1x256xf32> to vector<4x256xf32>
    %30 = arith.mulf %27, %29 : vector<4x256xf32>
    %c12 = arith.constant 12 : index
    %c0_10 = arith.constant 0 : index
    %31 = vector.load %arg6[%c12, %c0_10] : memref<36x256xf32, #tpu.memory_space<vmem>>, vector<4x256xf32>
    tpu.vector_store %arg6[%c12, %c0_10], %30 {strides = array<i32>} : memref<36x256xf32, #tpu.memory_space<vmem>>, vector<4x256xf32>,
    %32 = vector.extract_strided_slice %1 {offsets = [4, 0], sizes = [1, 256], strides = [1, 1]} : vector<9x256xf32> to vector<1x256xf32>
    %33 = vector.broadcast %32 : vector<1x256xf32> to vector<4x256xf32>
    %34 = arith.mulf %3, %33 : vector<4x256xf32>
    %c16 = arith.constant 16 : index
    %c0_11 = arith.constant 0 : index
    %35 = vector.load %arg6[%c16, %c0_11] : memref<36x256xf32, #tpu.memory_space<vmem>>, vector<4x256xf32>
    tpu.vector_store %arg6[%c16, %c0_11], %34 {strides = array<i32>} : memref<36x256xf32, #tpu.memory_space<vmem>>, vector<4x256xf32>,
    %36 = vector.extract_strided_slice %3 {offsets = [0, 1], sizes = [4, 255], strides = [1, 1]} : vector<4x256xf32> to vector<4x255xf32>
    %37 = vector.extract_strided_slice %3 {offsets = [0, 0], sizes = [4, 1], strides = [1, 1]} : vector<4x256xf32> to vector<4x1xf32>
    %38 = tpu.concatenate %36, %37 in 1 : vector<4x255xf32>, vector<4x1xf32> -> vector<4x256xf32>
    %39 = vector.extract_strided_slice %1 {offsets = [5, 0], sizes = [1, 256], strides = [1, 1]} : vector<9x256xf32> to vector<1x256xf32>
    %40 = vector.broadcast %39 : vector<1x256xf32> to vector<4x256xf32>
    %41 = arith.mulf %38, %40 : vector<4x256xf32>
    %c20 = arith.constant 20 : index
    %c0_12 = arith.constant 0 : index
    %42 = vector.load %arg6[%c20, %c0_12] : memref<36x256xf32, #tpu.memory_space<vmem>>, vector<4x256xf32>
    tpu.vector_store %arg6[%c20, %c0_12], %41 {strides = array<i32>} : memref<36x256xf32, #tpu.memory_space<vmem>>, vector<4x256xf32>,
    %43 = vector.extract_strided_slice %3 {offsets = [0, 15], sizes = [4, 241], strides = [1, 1]} : vector<4x256xf32> to vector<4x241xf32>
    %44 = vector.extract_strided_slice %3 {offsets = [0, 0], sizes = [4, 15], strides = [1, 1]} : vector<4x256xf32> to vector<4x15xf32>
    %45 = tpu.concatenate %43, %44 in 1 : vector<4x241xf32>, vector<4x15xf32> -> vector<4x256xf32>
    %46 = vector.extract_strided_slice %1 {offsets = [6, 0], sizes = [1, 256], strides = [1, 1]} : vector<9x256xf32> to vector<1x256xf32>
    %47 = vector.broadcast %46 : vector<1x256xf32> to vector<4x256xf32>
    %48 = arith.mulf %45, %47 : vector<4x256xf32>
    %c24 = arith.constant 24 : index
    %c0_13 = arith.constant 0 : index
    %49 = vector.load %arg6[%c24, %c0_13] : memref<36x256xf32, #tpu.memory_space<vmem>>, vector<4x256xf32>
    tpu.vector_store %arg6[%c24, %c0_13], %48 {strides = array<i32>} : memref<36x256xf32, #tpu.memory_space<vmem>>, vector<4x256xf32>,
    %50 = vector.extract_strided_slice %3 {offsets = [0, 16], sizes = [4, 240], strides = [1, 1]} : vector<4x256xf32> to vector<4x240xf32>
    %51 = vector.extract_strided_slice %3 {offsets = [0, 0], sizes = [4, 16], strides = [1, 1]} : vector<4x256xf32> to vector<4x16xf32>
    %52 = tpu.concatenate %50, %51 in 1 : vector<4x240xf32>, vector<4x16xf32> -> vector<4x256xf32>
    %53 = vector.extract_strided_slice %1 {offsets = [7, 0], sizes = [1, 256], strides = [1, 1]} : vector<9x256xf32> to vector<1x256xf32>
    %54 = vector.broadcast %53 : vector<1x256xf32> to vector<4x256xf32>
    %55 = arith.mulf %52, %54 : vector<4x256xf32>
    %c28 = arith.constant 28 : index
    %c0_14 = arith.constant 0 : index
    %56 = vector.load %arg6[%c28, %c0_14] : memref<36x256xf32, #tpu.memory_space<vmem>>, vector<4x256xf32>
    tpu.vector_store %arg6[%c28, %c0_14], %55 {strides = array<i32>} : memref<36x256xf32, #tpu.memory_space<vmem>>, vector<4x256xf32>,
    %57 = vector.extract_strided_slice %3 {offsets = [0, 17], sizes = [4, 239], strides = [1, 1]} : vector<4x256xf32> to vector<4x239xf32>
    %58 = vector.extract_strided_slice %3 {offsets = [0, 0], sizes = [4, 17], strides = [1, 1]} : vector<4x256xf32> to vector<4x17xf32>
    %59 = tpu.concatenate %57, %58 in 1 : vector<4x239xf32>, vector<4x17xf32> -> vector<4x256xf32>
    %60 = vector.extract_strided_slice %1 {offsets = [8, 0], sizes = [1, 256], strides = [1, 1]} : vector<9x256xf32> to vector<1x256xf32>
    %61 = vector.broadcast %60 : vector<1x256xf32> to vector<4x256xf32>
    %62 = arith.mulf %59, %61 : vector<4x256xf32>
    %c32 = arith.constant 32 : index
    %c0_15 = arith.constant 0 : index
    %63 = vector.load %arg6[%c32, %c0_15] : memref<36x256xf32, #tpu.memory_space<vmem>>, vector<4x256xf32>
    tpu.vector_store %arg6[%c32, %c0_15], %62 {strides = array<i32>} : memref<36x256xf32, #tpu.memory_space<vmem>>, vector<4x256xf32>,
    %c0_16 = arith.constant 0 : index
    %c0_17 = arith.constant 0 : index
    %64 = vector.load %arg6[%c0_16, %c0_17] : memref<36x256xf32, #tpu.memory_space<vmem>>, vector<36x256xf32>
    %cst = arith.constant dense<0.000000e+00> : vector<16x256xf32>
    %65 = tpu.matmul %0, %64, %cst {dimension_numbers = #tpu.dot_dimension_numbers<[1], [0], [0], [1], [0, 0, 1, 1], [], []>} : vector<16x36xf32>, vector<36x256xf32>, vector<16x256xf32> -> vector<16x256xf32>
    %cst_18 = arith.constant 0.000000e+00 : f32
    %66 = vector.broadcast %cst_18 : f32 to vector<16x256xf32>
    %67 = arith.maximumf %65, %66 : vector<16x256xf32>
    %c0_19 = arith.constant 0 : index
    %c0_20 = arith.constant 0 : index
    %c0_21 = arith.constant 0 : index
    %68 = vector.load %arg2[%c0_19, %c0_20, %c0_21] : memref<1x4x256xf32, #tpu.memory_space<vmem>>, vector<1x4x256xf32>
    %69 = vector.shape_cast %68 : vector<1x4x256xf32> to vector<4x256xf32>
    %70 = vector.extract_strided_slice %69 {offsets = [0, 239], sizes = [4, 17], strides = [1, 1]} : vector<4x256xf32> to vector<4x17xf32>
    %71 = vector.extract_strided_slice %69 {offsets = [0, 0], sizes = [4, 239], strides = [1, 1]} : vector<4x256xf32> to vector<4x239xf32>
    %72 = tpu.concatenate %70, %71 in 1 : vector<4x17xf32>, vector<4x239xf32> -> vector<4x256xf32>
    %73 = vector.extract_strided_slice %1 {offsets = [0, 0], sizes = [1, 256], strides = [1, 1]} : vector<9x256xf32> to vector<1x256xf32>
    %74 = vector.broadcast %73 : vector<1x256xf32> to vector<4x256xf32>
    %75 = arith.mulf %72, %74 : vector<4x256xf32>
    %c0_22 = arith.constant 0 : index
    %c0_23 = arith.constant 0 : index
    %76 = vector.load %arg6[%c0_22, %c0_23] : memref<36x256xf32, #tpu.memory_space<vmem>>, vector<4x256xf32>
    tpu.vector_store %arg6[%c0_22, %c0_23], %75 {strides = array<i32>} : memref<36x256xf32, #tpu.memory_space<vmem>>, vector<4x256xf32>,
    %77 = vector.extract_strided_slice %69 {offsets = [0, 240], sizes = [4, 16], strides = [1, 1]} : vector<4x256xf32> to vector<4x16xf32>
    %78 = vector.extract_strided_slice %69 {offsets = [0, 0], sizes = [4, 240], strides = [1, 1]} : vector<4x256xf32> to vector<4x240xf32>
    %79 = tpu.concatenate %77, %78 in 1 : vector<4x16xf32>, vector<4x240xf32> -> vector<4x256xf32>
    %80 = vector.extract_strided_slice %1 {offsets = [1, 0], sizes = [1, 256], strides = [1, 1]} : vector<9x256xf32> to vector<1x256xf32>
    %81 = vector.broadcast %80 : vector<1x256xf32> to vector<4x256xf32>
    %82 = arith.mulf %79, %81 : vector<4x256xf32>
    %c4_24 = arith.constant 4 : index
    %c0_25 = arith.constant 0 : index
    %83 = vector.load %arg6[%c4_24, %c0_25] : memref<36x256xf32, #tpu.memory_space<vmem>>, vector<4x256xf32>
    tpu.vector_store %arg6[%c4_24, %c0_25], %82 {strides = array<i32>} : memref<36x256xf32, #tpu.memory_space<vmem>>, vector<4x256xf32>,
    %84 = vector.extract_strided_slice %69 {offsets = [0, 241], sizes = [4, 15], strides = [1, 1]} : vector<4x256xf32> to vector<4x15xf32>
    %85 = vector.extract_strided_slice %69 {offsets = [0, 0], sizes = [4, 241], strides = [1, 1]} : vector<4x256xf32> to vector<4x241xf32>
    %86 = tpu.concatenate %84, %85 in 1 : vector<4x15xf32>, vector<4x241xf32> -> vector<4x256xf32>
    %87 = vector.extract_strided_slice %1 {offsets = [2, 0], sizes = [1, 256], strides = [1, 1]} : vector<9x256xf32> to vector<1x256xf32>
    %88 = vector.broadcast %87 : vector<1x256xf32> to vector<4x256xf32>
    %89 = arith.mulf %86, %88 : vector<4x256xf32>
    %c8_26 = arith.constant 8 : index
    %c0_27 = arith.constant 0 : index
    %90 = vector.load %arg6[%c8_26, %c0_27] : memref<36x256xf32, #tpu.memory_space<vmem>>, vector<4x256xf32>
    tpu.vector_store %arg6[%c8_26, %c0_27], %89 {strides = array<i32>} : memref<36x256xf32, #tpu.memory_space<vmem>>, vector<4x256xf32>,
    %91 = vector.extract_strided_slice %69 {offsets = [0, 255], sizes = [4, 1], strides = [1, 1]} : vector<4x256xf32> to vector<4x1xf32>
    %92 = vector.extract_strided_slice %69 {offsets = [0, 0], sizes = [4, 255], strides = [1, 1]} : vector<4x256xf32> to vector<4x255xf32>
    %93 = tpu.concatenate %91, %92 in 1 : vector<4x1xf32>, vector<4x255xf32> -> vector<4x256xf32>
    %94 = vector.extract_strided_slice %1 {offsets = [3, 0], sizes = [1, 256], strides = [1, 1]} : vector<9x256xf32> to vector<1x256xf32>
    %95 = vector.broadcast %94 : vector<1x256xf32> to vector<4x256xf32>
    %96 = arith.mulf %93, %95 : vector<4x256xf32>
    %c12_28 = arith.constant 12 : index
    %c0_29 = arith.constant 0 : index
    %97 = vector.load %arg6[%c12_28, %c0_29] : memref<36x256xf32, #tpu.memory_space<vmem>>, vector<4x256xf32>
    tpu.vector_store %arg6[%c12_28, %c0_29], %96 {strides = array<i32>} : memref<36x256xf32, #tpu.memory_space<vmem>>, vector<4x256xf32>,
    %98 = vector.extract_strided_slice %1 {offsets = [4, 0], sizes = [1, 256], strides = [1, 1]} : vector<9x256xf32> to vector<1x256xf32>
    %99 = vector.broadcast %98 : vector<1x256xf32> to vector<4x256xf32>
    %100 = arith.mulf %69, %99 : vector<4x256xf32>
    %c16_30 = arith.constant 16 : index
    %c0_31 = arith.constant 0 : index
    %101 = vector.load %arg6[%c16_30, %c0_31] : memref<36x256xf32, #tpu.memory_space<vmem>>, vector<4x256xf32>
    tpu.vector_store %arg6[%c16_30, %c0_31], %100 {strides = array<i32>} : memref<36x256xf32, #tpu.memory_space<vmem>>, vector<4x256xf32>,
    %102 = vector.extract_strided_slice %69 {offsets = [0, 1], sizes = [4, 255], strides = [1, 1]} : vector<4x256xf32> to vector<4x255xf32>
    %103 = vector.extract_strided_slice %69 {offsets = [0, 0], sizes = [4, 1], strides = [1, 1]} : vector<4x256xf32> to vector<4x1xf32>
    %104 = tpu.concatenate %102, %103 in 1 : vector<4x255xf32>, vector<4x1xf32> -> vector<4x256xf32>
    %105 = vector.extract_strided_slice %1 {offsets = [5, 0], sizes = [1, 256], strides = [1, 1]} : vector<9x256xf32> to vector<1x256xf32>
    %106 = vector.broadcast %105 : vector<1x256xf32> to vector<4x256xf32>
    %107 = arith.mulf %104, %106 : vector<4x256xf32>
    %c20_32 = arith.constant 20 : index
    %c0_33 = arith.constant 0 : index
    %108 = vector.load %arg6[%c20_32, %c0_33] : memref<36x256xf32, #tpu.memory_space<vmem>>, vector<4x256xf32>
    tpu.vector_store %arg6[%c20_32, %c0_33], %107 {strides = array<i32>} : memref<36x256xf32, #tpu.memory_space<vmem>>, vector<4x256xf32>,
    %109 = vector.extract_strided_slice %69 {offsets = [0, 15], sizes = [4, 241], strides = [1, 1]} : vector<4x256xf32> to vector<4x241xf32>
    %110 = vector.extract_strided_slice %69 {offsets = [0, 0], sizes = [4, 15], strides = [1, 1]} : vector<4x256xf32> to vector<4x15xf32>
    %111 = tpu.concatenate %109, %110 in 1 : vector<4x241xf32>, vector<4x15xf32> -> vector<4x256xf32>
    %112 = vector.extract_strided_slice %1 {offsets = [6, 0], sizes = [1, 256], strides = [1, 1]} : vector<9x256xf32> to vector<1x256xf32>
    %113 = vector.broadcast %112 : vector<1x256xf32> to vector<4x256xf32>
    %114 = arith.mulf %111, %113 : vector<4x256xf32>
    %c24_34 = arith.constant 24 : index
    %c0_35 = arith.constant 0 : index
    %115 = vector.load %arg6[%c24_34, %c0_35] : memref<36x256xf32, #tpu.memory_space<vmem>>, vector<4x256xf32>
    tpu.vector_store %arg6[%c24_34, %c0_35], %114 {strides = array<i32>} : memref<36x256xf32, #tpu.memory_space<vmem>>, vector<4x256xf32>,
    %116 = vector.extract_strided_slice %69 {offsets = [0, 16], sizes = [4, 240], strides = [1, 1]} : vector<4x256xf32> to vector<4x240xf32>
    %117 = vector.extract_strided_slice %69 {offsets = [0, 0], sizes = [4, 16], strides = [1, 1]} : vector<4x256xf32> to vector<4x16xf32>
    %118 = tpu.concatenate %116, %117 in 1 : vector<4x240xf32>, vector<4x16xf32> -> vector<4x256xf32>
    %119 = vector.extract_strided_slice %1 {offsets = [7, 0], sizes = [1, 256], strides = [1, 1]} : vector<9x256xf32> to vector<1x256xf32>
    %120 = vector.broadcast %119 : vector<1x256xf32> to vector<4x256xf32>
    %121 = arith.mulf %118, %120 : vector<4x256xf32>
    %c28_36 = arith.constant 28 : index
    %c0_37 = arith.constant 0 : index
    %122 = vector.load %arg6[%c28_36, %c0_37] : memref<36x256xf32, #tpu.memory_space<vmem>>, vector<4x256xf32>
    tpu.vector_store %arg6[%c28_36, %c0_37], %121 {strides = array<i32>} : memref<36x256xf32, #tpu.memory_space<vmem>>, vector<4x256xf32>,
    %123 = vector.extract_strided_slice %69 {offsets = [0, 17], sizes = [4, 239], strides = [1, 1]} : vector<4x256xf32> to vector<4x239xf32>
    %124 = vector.extract_strided_slice %69 {offsets = [0, 0], sizes = [4, 17], strides = [1, 1]} : vector<4x256xf32> to vector<4x17xf32>
    %125 = tpu.concatenate %123, %124 in 1 : vector<4x239xf32>, vector<4x17xf32> -> vector<4x256xf32>
    %126 = vector.extract_strided_slice %1 {offsets = [8, 0], sizes = [1, 256], strides = [1, 1]} : vector<9x256xf32> to vector<1x256xf32>
    %127 = vector.broadcast %126 : vector<1x256xf32> to vector<4x256xf32>
    %128 = arith.mulf %125, %127 : vector<4x256xf32>
    %c32_38 = arith.constant 32 : index
    %c0_39 = arith.constant 0 : index
    %129 = vector.load %arg6[%c32_38, %c0_39] : memref<36x256xf32, #tpu.memory_space<vmem>>, vector<4x256xf32>
    tpu.vector_store %arg6[%c32_38, %c0_39], %128 {strides = array<i32>} : memref<36x256xf32, #tpu.memory_space<vmem>>, vector<4x256xf32>,
    %c0_40 = arith.constant 0 : index
    %c0_41 = arith.constant 0 : index
    %130 = vector.load %arg6[%c0_40, %c0_41] : memref<36x256xf32, #tpu.memory_space<vmem>>, vector<36x256xf32>
    %cst_42 = arith.constant dense<0.000000e+00> : vector<16x256xf32>
    %131 = tpu.matmul %0, %130, %cst_42 {dimension_numbers = #tpu.dot_dimension_numbers<[1], [0], [0], [1], [0, 0, 1, 1], [], []>} : vector<16x36xf32>, vector<36x256xf32>, vector<16x256xf32> -> vector<16x256xf32>
    %cst_43 = arith.constant 0.000000e+00 : f32
    %132 = vector.broadcast %cst_43 : f32 to vector<16x256xf32>
    %133 = arith.maximumf %131, %132 : vector<16x256xf32>
    %134 = arith.subf %67, %133 : vector<16x256xf32>
    %135 = arith.mulf %134, %134 : vector<16x256xf32>
    %136 = vector.shape_cast %135 : vector<16x256xf32> to vector<1x16x256xf32>
    %cst_44 = arith.constant dense<0.000000e+00> : vector<1xf32>
    %137 = vector.multi_reduction <add>, %136, %cst_44 [1, 2] : vector<1x16x256xf32> to vector<1xf32>
    %138 = vector.shape_cast %137 : vector<1xf32> to vector<1x1x1xf32>
    %139 = vector.extract %138[0, 0, 0] : f32 from vector<1x1x1xf32>
    %cst_45 = arith.constant dense<0.000000e+00> : vector<16x16xf32>
    %140 = tpu.matmul %67, %67, %cst_45 {dimension_numbers = #tpu.dot_dimension_numbers<[1], [1], [0], [0], [0, 0, 1, 0], [], []>} : vector<16x256xf32>, vector<16x256xf32>, vector<16x16xf32> -> vector<16x16xf32>
    %cst_46 = arith.constant dense<0.000000e+00> : vector<16x16xf32>
    %141 = tpu.matmul %133, %133, %cst_46 {dimension_numbers = #tpu.dot_dimension_numbers<[1], [1], [0], [0], [0, 0, 1, 0], [], []>} : vector<16x256xf32>, vector<16x256xf32>, vector<16x16xf32> -> vector<16x16xf32>
    %142 = arith.subf %140, %141 : vector<16x16xf32>
    %cst_47 = arith.constant 2.44140625E-4 : f32
    %143 = vector.broadcast %cst_47 : f32 to vector<16x16xf32>
    %144 = arith.mulf %142, %143 : vector<16x16xf32>
    %145 = arith.mulf %144, %144 : vector<16x16xf32>
    %146 = vector.shape_cast %145 : vector<16x16xf32> to vector<1x16x16xf32>
    %cst_48 = arith.constant dense<0.000000e+00> : vector<1xf32>
    %147 = vector.multi_reduction <add>, %146, %cst_48 [1, 2] : vector<1x16x16xf32> to vector<1xf32>
    %148 = vector.shape_cast %147 : vector<1xf32> to vector<1x1x1xf32>
    %149 = vector.extract %148[0, 0, 0] : f32 from vector<1x1x1xf32>
    %150 = tpu.iota {dimensions = array<i32: 1>} : vector<1x8x128xi32>
    %151 = tpu.iota {dimensions = array<i32: 2>} : vector<1x8x128xi32>
    %c0_i32 = arith.constant 0 : i32
    %152 = vector.broadcast %c0_i32 : i32 to vector<1x8x128xi32>
    %153 = arith.cmpi eq, %150, %152 : vector<1x8x128xi32>
    %c0_i32_49 = arith.constant 0 : i32
    %154 = vector.broadcast %c0_i32_49 : i32 to vector<1x8x128xi32>
    %155 = arith.cmpi eq, %151, %154 : vector<1x8x128xi32>
    %156 = arith.andi %153, %155 : vector<1x8x128xi1>
    %c0_i32_50 = arith.constant 0 : i32
    %157 = vector.broadcast %c0_i32_50 : i32 to vector<1x8x128xi32>
    %158 = arith.cmpi eq, %150, %157 : vector<1x8x128xi32>
    %c1_i32 = arith.constant 1 : i32
    %159 = vector.broadcast %c1_i32 : i32 to vector<1x8x128xi32>
    %160 = arith.cmpi eq, %151, %159 : vector<1x8x128xi32>
    %161 = arith.andi %158, %160 : vector<1x8x128xi1>
    %cst_51 = arith.constant 0.000000e+00 : f32
    %162 = vector.broadcast %149 : f32 to vector<1x8x128xf32>
    %163 = vector.broadcast %cst_51 : f32 to vector<1x8x128xf32>
    %164 = arith.select %161, %162, %163 : vector<1x8x128xi1>, vector<1x8x128xf32>
    %165 = vector.broadcast %139 : f32 to vector<1x8x128xf32>
    %166 = arith.select %156, %165, %164 : vector<1x8x128xi1>, vector<1x8x128xf32>
    %c0_52 = arith.constant 0 : index
    %c0_53 = arith.constant 0 : index
    %c0_54 = arith.constant 0 : index
    %167 = vector.load %arg5[%c0_52, %c0_53, %c0_54] : memref<1x8x128xf32, #tpu.memory_space<vmem>>, vector<1x8x128xf32>
    tpu.vector_store %arg5[%c0_52, %c0_53, %c0_54], %166 {strides = array<i32>} : memref<1x8x128xf32, #tpu.memory_space<vmem>>, vector<1x8x128xf32>,
    return
  }
  func.func @transform_0(%arg0: i32) -> (i32, i32, i32) {
    %c0_i32 = arith.constant 0 : i32
    %c0_i32_0 = arith.constant 0 : i32
    %c0_i32_1 = arith.constant 0 : i32
    return %arg0, %c0_i32, %c0_i32_0 : i32, i32, i32
  }
  func.func @transform_1(%arg0: i32) -> (i32, i32, i32) {
    %c0_i32 = arith.constant 0 : i32
    %c0_i32_0 = arith.constant 0 : i32
    %c0_i32_1 = arith.constant 0 : i32
    return %arg0, %c0_i32, %c0_i32_0 : i32, i32, i32
  }
  func.func @transform_2(%arg0: i32) -> (i32, i32) {
    %c0_i32 = arith.constant 0 : i32
    %c0_i32_0 = arith.constant 0 : i32
    %c0_i32_1 = arith.constant 0 : i32
    return %c0_i32, %c0_i32_0 : i32, i32
  }
  func.func @transform_3(%arg0: i32) -> (i32, i32) {
    %c0_i32 = arith.constant 0 : i32
    %c0_i32_0 = arith.constant 0 : i32
    %c0_i32_1 = arith.constant 0 : i32
    return %c0_i32, %c0_i32_0 : i32, i32
  }
  func.func @transform_4(%arg0: i32) -> (i32, i32, i32) {
    %c0_i32 = arith.constant 0 : i32
    %c0_i32_0 = arith.constant 0 : i32
    %c0_i32_1 = arith.constant 0 : i32
    return %arg0, %c0_i32, %c0_i32_0 : i32, i32, i32
  }
}

</mosaic_0001>

<bundles_post_ra>
// kernel: _loss.3
= control target key start
LH: loop header
LB: loop body
LE: loop exit
PB: predicated region body
PF: predicated region fallthrough
CT: control target
= control target key end

     0   :  { %s1138_s15 = smov 0   ;;  %s1349_s0 = inlined_call_operand.vmem [shape: f32[2,4,256], index: 0, kind: input, shape index: {}]   ;;  %s1350_s1 = inlined_call_operand.vmem [shape: f32[2,4,256], index: 1, kind: input, shape index: {}]   ;;  %s1351_s2 = inlined_call_operand.vmem [shape: f32[16,36], index: 2, kind: input, shape index: {}]   ;;  %s1352_s3 = inlined_call_operand.vmem [shape: f32[9,256], index: 3, kind: input, shape index: {}]   ;;  %s1353_s4 = inlined_call_operand.vmem [shape: f32[2,8,128], index: 4, kind: output, shape index: {}]  }
   0x1 LB: > { %s1049_s16 = sadd.s32 4294967295, %s1102_s15   ;;  %p1053_p0 = scmp.ge.s32.totalorder %s1102_s15, 1  ;;  %s1102_s15 = sphi %s1138_s15, %s14_s15  }
   0x2   : > { %p172_p1 = scmp.lt.s32.totalorder %s1102_s15, 3 }
   0x4   : > { %p173_p2 = pnand %p1053_p0, %p172_p1 }
   0x5   : > { %p202_p3 = scmp.lt.s32.totalorder (!%p173_p2), %s1049_s16, 1  ;;  %s1104_s25 = smov (!%p173_p2), 111  }
   0x6   : > { %176 = sbr.rel (%p173_p2) target bundleno = 822 (0x336), region = 36  ;;  %s1105_s26 = smov (!%p173_p2), 112  }
   0x7   : > { %s1106_s27 = smov (!%p173_p2), 127   ;;  %s1107_s5 = smov (!%p173_p2), 113  }
   0x8   : > { %s1108_s6 = smov (!%p173_p2), 1   ;;  %s1109_s7 = smov (!%p173_p2), 16  }
   0x9   : > { %s1110_s8 = smov (!%p173_p2), 15   ;;  %s1111_s9 = smov (!%p173_p2), 17  }
   0xb   : > { %v235_v0 = vlaneseq  ;;  %s1355_s16 = smov (!%p202_p3, %s1049_s16), 1  ;;  %v1159_v3 = vld [vmem:[%s1352_s3] sm:$0xff]  ;;  %v1164_v4 = vld [vmem:[%s1352_s3 + $0x8] sm:$0xff]  ;;  %v1112_v15 = vmov 0.0   ;;  %vm425_vm0 = vcmask 908288   ;;  %vm347_vm1 = vcmask 1039360  }
   0xc   : > { %s1149_s17 = sshll.u32 %s1355_s16, 3  ;;  %531 = vmatprep.mubr.f32.mxu0 %v1112_v15  ;;  %765 = vmatprep.mubr.f32.mxu1 %v1112_v15  ;;  %v1193_v20 = vld [vmem:[%s1352_s3 + $0x10] ss:$0 sm:$0xff]  ;;  %v1198_v21 = vld [vmem:[%s1352_s3 + $0x18] ss:$0 sm:$0xff]  ;;  %vm397_vm2 = vcmask 916480  }
   0xd   : > { %v1147_v1 = vshrl.u32 %v235_v0, 7  ;;  %s206_s20 = scalar_lea.vmem %s1349_s0, %s1149_s17  ;;  %s211_s30 = scalar_lea.vmem %s1350_s1, %s1149_s17  ;;  %vm375_vm3 = vcmask 924672   ;;  %vm460_vm4 = vcmask 1043456   ;;  %vm302_vm5 = vcmask 7168  }
   0xe   : > { %v222_v5 = vld [vmem:[%s206_s20] sm:$0xff]  ;;  %vm252_vm6 = vcmask 130048   ;;  %vm280_vm7 = vcmask 121856   ;;  %vm230_vm8 = vcmask 138240   ;;  %vm453_vm9 = vcmask 293888   ;;  %s215_s24 = scalar_lea.vmem %s1353_s4, %s1149_s17 }
   0xf   : > { %v327_v2 = vsub.s32 4, %v1147_v1  ;;  %421 = vrot.lane.b32.xlu1 %v222_v5, %s1104_s25  ;;  %393 = vrot.lane.b32.xlu0 %v222_v5, %s1105_s26  ;;  %v224_v6 = vcombine.high %v222_v5, %v222_v5  ;;  %v548_v12 = vld [vmem:[%s211_s30] sm:$0xff]  ;;  %v355_v18 = vsub.s32 5, %v1147_v1  ;;  %v405_v19 = vsub.s32 7, %v1147_v1 }
  0x10   : > { %v550_v14 = vcombine.high %v548_v12, %v548_v12  ;;  %v383_v24 = vsub.s32 6, %v1147_v1  ;;  %v309_v37 = vsub.s32 3, %v1147_v1  ;;  %v259_v54 = vsub.s32 1, %v1147_v1 }
  0x11   : > { %v328_v7 = vrot.slane %v1159_v3, %v327_v2  ;;  %v332_v8 = vrot.slane %v1164_v4, %v327_v2  ;;  %v1204_v27 = vrot.slane %v1159_v3, %v355_v18  ;;  %v1207_v28 = vrot.slane %v1164_v4, %v355_v18 }
  0x12   : > { %v1212_v31 = vrot.slane %v1159_v3, %v405_v19  ;;  %v1215_v32 = vrot.slane %v1164_v4, %v405_v19  ;;  %v1218_v35 = vrot.slane %v1159_v3, %v383_v24  ;;  %v1221_v36 = vrot.slane %v1164_v4, %v383_v24 }
  0x13   : > { %v335_v9 = vcombine.low %v328_v7, %v332_v8  ;;  %343 = vrot.lane.b32.xlu0 %v222_v5, %s1106_s27  ;;  %423 = vrot.lane.b32.xlu1 %v224_v6, %s1104_s25  ;;  %v1238_v57 = vrot.slane %v1159_v3, %v309_v37  ;;  %v1241_v58 = vrot.slane %v1164_v4, %v309_v37  ;;  %vm974_vm10 = vcmp.eq.s32.totalorder %v1147_v1, 0 }
  0x15   : > { %v337_v10 = vmul.f32 %v335_v9, %v222_v5  ;;  %v1178_v13 = vmul.f32 %v548_v12, %v335_v9  ;;  %v1254_v9 = vrot.slane %v1164_v4, %v259_v54 }
  0x17   : > { %v339_v11 = vcombine.high %v337_v10, %v337_v10  ;;  %341 = vst [vmem:[#allocation2 + $0x48] sm:$0xf] %v337_v10  ;;  %345 = vrot.lane.b32.xlu1 %v224_v6, %s1106_s27  ;;  %395 = vrot.lane.b32.xlu0 %v224_v6, %s1105_s26  ;;  %v617_v10 = vcombine.high %v1178_v13, %v1178_v13 }
  0x19   : > { %342 = vst [vmem:[#allocation2 + $0x28] sm:$0xf] %v339_v11 }
  0x1b   : > { %373 = vrot.lane.b32.xlu1 %v224_v6, %s1107_s5  ;;  %371 = vrot.lane.b32.xlu0 %v222_v5, %s1107_s5 }
  0x1f   : > { %300 = vrot.lane.b32.xlu1 %v222_v5, %s1108_s6  ;;  %297 = vrot.lane.b32.xlu0 %v224_v6, %s1108_s6 }
  0x23   : > { %250 = vrot.lane.b32.xlu1 %v222_v5, %s1109_s7  ;;  %247 = vrot.lane.b32.xlu0 %v224_v6, %s1109_s7 }
  0x27   : > { %278 = vrot.lane.b32.xlu1 %v222_v5, %s1110_s8  ;;  %275 = vrot.lane.b32.xlu0 %v224_v6, %s1110_s8 }
  0x2b   : > { %228 = vrot.lane.b32.xlu1 %v222_v5, %s1111_s9  ;;  %225 = vrot.lane.b32.xlu0 %v224_v6, %s1111_s9  ;;  %v1248_v5 = vrot.slane %v1159_v3, %v259_v54  ;;  %v287_v6 = vsub.s32 2, %v1147_v1 }
  0x2d   : > { %v1261_v19 = vrot.slane %v1159_v3, %v287_v6 }
  0x2f   : > { %655 = vrot.lane.b32.xlu1 %v550_v14, %s1105_s26  ;;  %653 = vrot.lane.b32.xlu0 %v548_v12, %s1105_s26 }
  0x33   : > { %674 = vrot.lane.b32.xlu1 %v550_v14, %s1104_s25  ;;  %672 = vrot.lane.b32.xlu0 %v548_v12, %s1104_s25 }
  0x37   : > { %623 = vrot.lane.b32.xlu1 %v550_v14, %s1106_s27  ;;  %621 = vrot.lane.b32.xlu0 %v548_v12, %s1106_s27 }
  0x3b   : > { %642 = vrot.lane.b32.xlu1 %v550_v14, %s1107_s5  ;;  %640 = vrot.lane.b32.xlu0 %v548_v12, %s1107_s5 }
  0x3f   : > { %599 = vrot.lane.b32.xlu1 %v548_v12, %s1108_s6  ;;  %596 = vrot.lane.b32.xlu0 %v550_v14, %s1108_s6 }
  0x43   : > { %567 = vrot.lane.b32.xlu1 %v548_v12, %s1109_s7  ;;  %564 = vrot.lane.b32.xlu0 %v550_v14, %s1109_s7 }
  0x47   : > { %586 = vrot.lane.b32.xlu1 %v548_v12, %s1110_s8  ;;  %583 = vrot.lane.b32.xlu0 %v550_v14, %s1110_s8 }
  0x4b   : > { %554 = vrot.lane.b32.xlu1 %v548_v12, %s1111_s9  ;;  %551 = vrot.lane.b32.xlu0 %v550_v14, %s1111_s9 }
  0x81   : > { %v422_v16 = vpop.permute.xlu1 %421  ;;  %v394_v17 = vpop.permute.xlu0 %393 }
  0x85   : > { %v344_v22 = vpop.permute.xlu0 %343  ;;  %v424_v23 = vpop.permute.xlu1 %423 }
  0x86   : > { %v426_v25 = vsel %vm425_vm0, %v422_v16, %v424_v23  ;;  %v430_v26 = vsel %vm425_vm0, %v424_v23, %v422_v16 }
  0x87   : > { %v439_v29 = vmul.f32 %v1193_v20, %v426_v25  ;;  %v440_v30 = vmul.f32 %v1198_v21, %v430_v26  ;;  %v1266_v26 = vrot.slane %v1164_v4, %v287_v6 }
  0x89   : > { %441 = vst [vmem:[#allocation2 + $0x40] sm:$0xf] %v439_v29  ;;  %442 = vst [vmem:[#allocation2 + $0x38] sm:$0xf] %v440_v30  ;;  %v346_v33 = vpop.permute.xlu1 %345  ;;  %v396_v34 = vpop.permute.xlu0 %395  ;;  %v237_v29 = vsub.s32 0, %v1147_v1 }
  0x8a   : > { %v348_v38 = vsel %vm347_vm1, %v344_v22, %v346_v33  ;;  %v352_v39 = vsel %vm347_vm1, %v346_v33, %v344_v22  ;;  %v398_v40 = vsel %vm397_vm2, %v394_v17, %v396_v34  ;;  %v402_v41 = vsel %vm397_vm2, %v396_v34, %v394_v17 }
  0x8b   : > { %v361_v42 = vmul.f32 %v1204_v27, %v348_v38  ;;  %v362_v43 = vmul.f32 %v1207_v28, %v352_v39  ;;  %v411_v44 = vmul.f32 %v1212_v31, %v398_v40  ;;  %v412_v45 = vmul.f32 %v1215_v32, %v402_v41 }
  0x8d   : > { %v365_v46 = vrot.slane %v361_v42, 4  ;;  %v366_v47 = vrot.slane %v362_v43, 4  ;;  %v415_v48 = vrot.slane %v411_v44, 4  ;;  %v416_v49 = vrot.slane %v412_v45, 4  ;;  %v374_v50 = vpop.permute.xlu1 %373  ;;  %v372_v51 = vpop.permute.xlu0 %371 }
  0x8e   : > { %v376_v52 = vsel %vm375_vm3, %v372_v51, %v374_v50  ;;  %v380_v53 = vsel %vm375_vm3, %v374_v50, %v372_v51  ;;  %v1275_v43 = vrot.slane %v1159_v3, %v237_v29  ;;  %v1278_v44 = vrot.slane %v1164_v4, %v237_v29 }
  0x8f   : > { %369 = vst [vmem:[#allocation2 + $0x48] sm:$0xf0] %v365_v46  ;;  %370 = vst [vmem:[#allocation2 + $0x28] sm:$0xf0] %v366_v47  ;;  %v389_v55 = vmul.f32 %v1218_v35, %v376_v52  ;;  %v390_v56 = vmul.f32 %v1221_v36, %v380_v53 }
  0x90   : > { %419 = vst [vmem:[#allocation2 + $0x8] sm:$0xf0] %v415_v48  ;;  %420 = vst [vmem:[#allocation2 + $0x20] sm:$0xf0] %v416_v49  ;;  %v452_v59 = vld [vmem:[#allocation2 + $0x38] sm:$0xf] }
  0x91   : > { %v451_v60 = vld [vmem:[#allocation2 + $0x40] sm:$0xf]  ;;  %391 = vst [vmem:[#allocation2 + $0x8] sm:$0xf] %v389_v55  ;;  %392 = vst [vmem:[#allocation2 + $0x20] sm:$0xf] %v390_v56  ;;  %1061 = vmatprep.subr.msk.mxu0 %vm460_vm4, %v452_v59  ;;  %v301_v61 = vpop.permute.xlu1 %300  ;;  %v298_v62 = vpop.permute.xlu0 %297 }
  0x92   : > { %v303_v63 = vsel %vm302_vm5, %v301_v61, %v298_v62  ;;  %v306_v2 = vsel %vm302_vm5, %v298_v62, %v301_v61  ;;  %1062 = vmatpush1.msk.msra.mxu0 %vm460_vm4, %v451_v60 }
  0x93   : > { %v315_v7 = vmul.f32 %v1238_v57, %v306_v2  ;;  %v316_v8 = vmul.f32 %v1241_v58, %v303_v63 }
  0x95   : > { %v319_v11 = vrot.slane %v315_v7, 4  ;;  %v320_v12 = vrot.slane %v316_v8, 4  ;;  %v251_v14 = vpop.permute.xlu1 %250  ;;  %v248_v16 = vpop.permute.xlu0 %247  ;;  %v1295_v8 = vld [vmem:[%s1351_s2] sm:$0xff] }
  0x96   : > { %v253_v17 = vsel %vm252_vm6, %v251_v14, %v248_v16  ;;  %v256_v18 = vsel %vm252_vm6, %v248_v16, %v251_v14  ;;  %v448_v22 = vld [vmem:[#allocation2 + $0x28] sm:$0xff] }
  0x97   : > { %v447_v23 = vld [vmem:[#allocation2 + $0x48] sm:$0xff]  ;;  %323 = vst [vmem:[#allocation2 + $0x18] sm:$0xf0] %v319_v11  ;;  %324 = vst [vmem:[#allocation2 + $0x10] sm:$0xf0] %v320_v12  ;;  %v265_v24 = vmul.f32 %v1248_v5, %v256_v18  ;;  %v266_v25 = vmul.f32 %v1254_v9, %v253_v17 }
  0x98   : > { %620 = vst [vmem:[#allocation2 + $0x28] sm:$0xf] %v617_v10  ;;  %619 = vst [vmem:[#allocation2 + $0x48] sm:$0xf] %v1178_v13  ;;  %v450_v30 = vld [vmem:[#allocation2 + $0x20] sm:$0xff]  ;;  %v449_v33 = vld [vmem:[#allocation2 + $0x8] sm:$0xff] }
  0x99   : > { %v269_v34 = vrot.slane %v265_v24, 4  ;;  %v270_v37 = vrot.slane %v266_v25, 4  ;;  %v279_v38 = vpop.permute.xlu1 %278  ;;  %491 = vmatprep.subr.mxu0 %v450_v30  ;;  %v276_v39 = vpop.permute.xlu0 %275  ;;  %v1307_v16 = vld [vmem:[%s1351_s2 + $0x8] sm:$0xff] }
  0x9a   : > { %v281_v40 = vsel %vm280_vm7, %v279_v38, %v276_v39  ;;  %v284_v41 = vsel %vm280_vm7, %v276_v39, %v279_v38  ;;  %492 = vmatpush1.msra.mxu0 %v449_v33 }
  0x9b   : > { %273 = vst [vmem:[#allocation2 + $0x30] sm:$0xf0] %v269_v34  ;;  %274 = vst [vmem:[#allocation2] sm:$0xf0] %v270_v37  ;;  %v293_v42 = vmul.f32 %v1261_v19, %v284_v41  ;;  %v294_v13 = vmul.f32 %v1266_v26, %v281_v40  ;;  %493 = vmatprep.subr.mxu0 %v448_v22 }
  0x9c   : > { %494 = vmatpush1.msra.mxu0 %v447_v23 }
  0x9d   : > { %295 = vst [vmem:[#allocation2 + $0x18] sm:$0xf] %v293_v42  ;;  %296 = vst [vmem:[#allocation2 + $0x10] sm:$0xf] %v294_v13  ;;  %v229_v45 = vpop.permute.xlu1 %228  ;;  %v226_v46 = vpop.permute.xlu0 %225 }
  0x9e   : > { %v231_v47 = vsel %vm230_vm8, %v229_v45, %v226_v46  ;;  %v234_v48 = vsel %vm230_vm8, %v226_v46, %v229_v45 }
  0x9f   : > { %v243_v49 = vmul.f32 %v1275_v43, %v234_v48  ;;  %v244_v50 = vmul.f32 %v1278_v44, %v231_v47 }
  0xa1   : > { %245 = vst [vmem:[#allocation2 + $0x30] sm:$0xf] %v243_v49  ;;  %246 = vst [vmem:[#allocation2] sm:$0xf] %v244_v50  ;;  %v656_v3 = vpop.permute.xlu1 %655  ;;  %v654_v51 = vpop.permute.xlu0 %653 }
  0xa2   : > { %v657_v4 = vsel %vm397_vm2, %v654_v51, %v656_v3  ;;  %v661_v52 = vsel %vm397_vm2, %v656_v3, %v654_v51 }
  0xa3   : > { %v662_v53 = vmul.f32 %v657_v4, %v1212_v31  ;;  %v663_v54 = vmul.f32 %v661_v52, %v1215_v32 }
  0xa4   : > { %v446_v55 = vld [vmem:[#allocation2 + $0x10] sm:$0xff]  ;;  %v445_v56 = vld [vmem:[#allocation2 + $0x18] sm:$0xff] }
  0xa5   : > { %v666_v59 = vrot.slane %v662_v53, 4  ;;  %v667_v60 = vrot.slane %v663_v54, 4  ;;  %v675_v61 = vpop.permute.xlu1 %674  ;;  %495 = vmatprep.subr.mxu0 %v446_v55  ;;  %v673_v62 = vpop.permute.xlu0 %672 }
  0xa6   : > { %v676_v63 = vsel %vm425_vm0, %v673_v62, %v675_v61  ;;  %v680_v2 = vsel %vm425_vm0, %v675_v61, %v673_v62  ;;  %496 = vmatpush1.msra.mxu0 %v445_v56 }
  0xa7   : > { %670 = vst [vmem:[#allocation2 + $0x8] sm:$0xf0] %v666_v59  ;;  %671 = vst [vmem:[#allocation2 + $0x20] sm:$0xf0] %v667_v60  ;;  %v681_v6 = vmul.f32 %v1193_v20, %v676_v63  ;;  %v682_v31 = vmul.f32 %v1198_v21, %v680_v2 }
  0xa8   : > { %v444_v7 = vld [vmem:[#allocation2] sm:$0xff]  ;;  %v443_v32 = vld [vmem:[#allocation2 + $0x30] sm:$0xff] }
  0xa9   : > { %683 = vst [vmem:[#allocation2 + $0x40] sm:$0xf] %v681_v6  ;;  %684 = vst [vmem:[#allocation2 + $0x38] sm:$0xf] %v682_v31  ;;  %v624_v10 = vpop.permute.xlu1 %623  ;;  %497 = vmatprep.subr.mxu0 %v444_v7  ;;  %v622_v11 = vpop.permute.xlu0 %621 }
  0xaa   : > { %v625_v12 = vsel %vm347_vm1, %v622_v11, %v624_v10  ;;  %v629_v14 = vsel %vm347_vm1, %v624_v10, %v622_v11  ;;  %498 = vmatpush1.msra.mxu0 %v443_v32 }
  0xab   : > { %v630_v20 = vmul.f32 %v625_v12, %v1204_v27  ;;  %v631_v21 = vmul.f32 %v629_v14, %v1207_v28  ;;  %1063 = vmatmul.mubr.msk.f32.vlgmr.msra.gmra.mxu0 %vm453_vm9, %v1295_v8 }
  0xac   : > { %537 = vmatprep.mubr.f32.mxu0 %v1112_v15 }
  0xad   : > { %v634_v17 = vrot.slane %v630_v20, 4  ;;  %v635_v18 = vrot.slane %v631_v21, 4  ;;  %v643_v22 = vpop.permute.xlu1 %642  ;;  %v641_v23 = vpop.permute.xlu0 %640 }
  0xae   : > { %v644_v24 = vsel %vm375_vm3, %v641_v23, %v643_v22  ;;  %v648_v27 = vsel %vm375_vm3, %v643_v22, %v641_v23 }
  0xaf   : > { %638 = vst [vmem:[#allocation2 + $0x48] sm:$0xf0] %v634_v17  ;;  %639 = vst [vmem:[#allocation2 + $0x28] sm:$0xf0] %v635_v18  ;;  %v649_v28 = vmul.f32 %v644_v24, %v1218_v35  ;;  %v650_v25 = vmul.f32 %v648_v27, %v1221_v36  ;;  %1064 = vmatmul.mubr.msk.f32.gmra.mxu0 %vm453_vm9, %v1307_v16 }
  0xb0   : > { %v694_v29 = vld [vmem:[#allocation2 + $0x38] sm:$0xf]  ;;  %v693_v30 = vld [vmem:[#allocation2 + $0x40] sm:$0xf] }
  0xb1   : > { %651 = vst [vmem:[#allocation2 + $0x8] sm:$0xf] %v649_v28  ;;  %652 = vst [vmem:[#allocation2 + $0x20] sm:$0xf] %v650_v25  ;;  %v600_v33 = vpop.permute.xlu1 %599  ;;  %1065 = vmatprep.subr.msk.mxu1 %vm460_vm4, %v694_v29  ;;  %v597_v34 = vpop.permute.xlu0 %596 }
  0xb2   : > { %v601_v37 = vsel %vm302_vm5, %v600_v33, %v597_v34  ;;  %v604_v38 = vsel %vm302_vm5, %v597_v34, %v600_v33  ;;  %1066 = vmatpush1.msk.msra.mxu1 %vm460_vm4, %v693_v30 }
  0xb3   : > { %v605_v35 = vmul.f32 %v604_v38, %v1238_v57  ;;  %v606_v36 = vmul.f32 %v601_v37, %v1241_v58 }
  0xb5   : > { %v609_v39 = vrot.slane %v605_v35, 4  ;;  %v610_v40 = vrot.slane %v606_v36, 4  ;;  %v568_v41 = vpop.permute.xlu1 %567  ;;  %v565_v42 = vpop.permute.xlu0 %564 }
  0xb6   : > { %v569_v13 = vsel %vm252_vm6, %v568_v41, %v565_v42  ;;  %v572_v45 = vsel %vm252_vm6, %v565_v42, %v568_v41  ;;  %v690_v52 = vld [vmem:[#allocation2 + $0x28] sm:$0xff] }
  0xb7   : > { %613 = vst [vmem:[#allocation2 + $0x18] sm:$0xf0] %v609_v39  ;;  %614 = vst [vmem:[#allocation2 + $0x10] sm:$0xf0] %v610_v40  ;;  %v573_v46 = vmul.f32 %v572_v45, %v1248_v5  ;;  %v574_v47 = vmul.f32 %v569_v13, %v1254_v9  ;;  %v689_v9 = vld [vmem:[#allocation2 + $0x48] sm:$0xff] }
  0xb8   : > { %v692_v48 = vld [vmem:[#allocation2 + $0x20] sm:$0xff]  ;;  %v691_v49 = vld [vmem:[#allocation2 + $0x8] sm:$0xff] }
  0xb9   : > { %v577_v50 = vrot.slane %v573_v46, 4  ;;  %v578_v57 = vrot.slane %v574_v47, 4  ;;  %v587_v3 = vpop.permute.xlu1 %586  ;;  %725 = vmatprep.subr.mxu1 %v692_v48  ;;  %v584_v58 = vpop.permute.xlu0 %583 }
  0xba   : > { %v588_v51 = vsel %vm280_vm7, %v587_v3, %v584_v58  ;;  %v591_v4 = vsel %vm280_vm7, %v584_v58, %v587_v3  ;;  %726 = vmatpush1.msra.mxu1 %v691_v49 }
  0xbb   : > { %581 = vst [vmem:[#allocation2 + $0x30] sm:$0xf0] %v577_v50  ;;  %582 = vst [vmem:[#allocation2] sm:$0xf0] %v578_v57  ;;  %v592_v53 = vmul.f32 %v591_v4, %v1261_v19  ;;  %v593_v5 = vmul.f32 %v588_v51, %v1266_v26  ;;  %727 = vmatprep.subr.mxu1 %v690_v52 }
  0xbc   : > { %728 = vmatpush1.msra.mxu1 %v689_v9 }
  0xbd   : > { %594 = vst [vmem:[#allocation2 + $0x18] sm:$0xf] %v592_v53  ;;  %595 = vst [vmem:[#allocation2 + $0x10] sm:$0xf] %v593_v5  ;;  %v555_v54 = vpop.permute.xlu1 %554  ;;  %v552_v55 = vpop.permute.xlu0 %551 }
  0xbe   : > { %v556_v56 = vsel %vm230_vm8, %v555_v54, %v552_v55  ;;  %v559_v59 = vsel %vm230_vm8, %v552_v55, %v555_v54 }
  0xbf   : > { %v560_v60 = vmul.f32 %v559_v59, %v1275_v43  ;;  %v561_v61 = vmul.f32 %v556_v56, %v1278_v44 }
  0xc1   : > { %562 = vst [vmem:[#allocation2 + $0x30] sm:$0xf] %v560_v60  ;;  %563 = vst [vmem:[#allocation2] sm:$0xf] %v561_v61 }
  0xc4   : > { %v688_v19 = vld [vmem:[#allocation2 + $0x10] sm:$0xff]  ;;  %v687_v62 = vld [vmem:[#allocation2 + $0x18] sm:$0xff] }
  0xc5   : > { %729 = vmatprep.subr.mxu1 %v688_v19  ;;  %v973_v19 = vand.u32 127, %v235_v0 }
  0xc6   : > { %730 = vmatpush1.msra.mxu1 %v687_v62 }
  0xc7   : > { %vm977_vm11 = vcmp.eq.s32.totalorder %v973_v19, 1  ;;  %vm975_vm12 = vcmp.eq.s32.totalorder %v973_v19, 0 }
  0xc8   : > { %v686_v26 = vld [vmem:[#allocation2] sm:$0xff]  ;;  %v685_v63 = vld [vmem:[#allocation2 + $0x30] sm:$0xff]  ;;  %vm978_vm13 = vmand %vm974_vm10, %vm977_vm11 }
  0xc9   : > { %731 = vmatprep.subr.mxu1 %v686_v26  ;;  %vm976_vm14 = vmand %vm974_vm10, %vm975_vm12 }
  0xca   : > { %732 = vmatpush1.msra.mxu1 %v685_v63 }
  0xcb   : > { %1067 = vmatmul.mubr.msk.f32.vlgmr.msra.gmra.mxu1 %vm453_vm9, %v1295_v8 }
  0xcc   : > { %771 = vmatprep.mubr.f32.mxu1 %v1112_v15 }
  0xcf   : > { %1068 = vmatmul.mubr.msk.f32.gmra.mxu1 %vm453_vm9, %v1307_v16 }
 0x16b   : > { %v533_v43 = vpop.f32.mrf.mxu0 }
 0x16c   : > { %v544_v10 = vmax.f32 %v533_v43, 0.0 }
 0x16d   : > { %v535_v44 = vpop.f32.mrf.mxu0 }
 0x16e   : > { %v545_v2 = vmax.f32 %v535_v44, 0.0 }
 0x16f   : > { %v539_v6 = vpop.f32.mrf.mxu0 }
 0x170   : > { %866 = vmatprep.mubr.f32.mxu0 %v545_v2  ;;  %v546_v31 = vmax.f32 %v539_v6, 0.0 }
 0x171   : > { %v541_v7 = vpop.f32.mrf.mxu0 }
 0x172   : > { %v547_v32 = vmax.f32 %v541_v7, 0.0 }
 0x174   : > { %830 = vmatprep.subr.mxu0 %v547_v32 }
 0x175   : > { %831 = vmatpush1.xpose.msra.mxu0 %v546_v31 }
 0x176   : > { %832 = vmatprep.subr.mxu0 %v545_v2 }
 0x179   : > { %833 = vmatpush1.xpose.msra.mxu0 %v544_v10 }
 0x17c   : > { %867 = vmatmul.mubr.f32.vlgmr.msra.gmra.mxu0 %v544_v10 }
 0x17d   : > { %871 = vmatprep.mubr.f32.mxu0 %v547_v32 }
 0x180   : > { %872 = vmatmul.mubr.f32.gmra.mxu0 %v546_v31 }
 0x18b   : > { %v767_v15 = vpop.f32.mrf.mxu1 }
 0x18c   : > { %v778_v8 = vmax.f32 %v767_v15, 0.0 }
 0x18d   : > { %v769_v11 = vpop.f32.mrf.mxu1 }
 0x18e   : > { %v782_v12 = vsub.f32 %v544_v10, %v778_v8  ;;  %v779_v14 = vmax.f32 %v769_v11, 0.0 }
 0x18f   : > { %v773_v20 = vpop.f32.mrf.mxu1 }
 0x190   : > { %v783_v21 = vsub.f32 %v545_v2, %v779_v14  ;;  %v780_v16 = vmax.f32 %v773_v20, 0.0  ;;  %941 = vmatprep.mubr.f32.mxu1 %v779_v14  ;;  %v786_v18 = vmul.f32 %v782_v12, %v782_v12 }
 0x191   : > { %v775_v17 = vpop.f32.mrf.mxu1 }
 0x192   : > { %v787_v22 = vmul.f32 %v783_v21, %v783_v21  ;;  %v784_v23 = vsub.f32 %v546_v31, %v780_v16  ;;  %v781_v24 = vmax.f32 %v775_v17, 0.0 }
 0x194   : > { %905 = vmatprep.subr.mxu1 %v781_v24  ;;  %v785_v27 = vsub.f32 %v547_v32, %v781_v24  ;;  %v788_v28 = vmul.f32 %v784_v23, %v784_v23  ;;  %v790_v25 = vadd.f32 %v787_v22, %v786_v18 }
 0x195   : > { %906 = vmatpush1.xpose.msra.mxu1 %v780_v16 }
 0x196   : > { %907 = vmatprep.subr.mxu1 %v779_v14  ;;  %v789_v29 = vmul.f32 %v785_v27, %v785_v27  ;;  %v791_v30 = vadd.f32 %v790_v25, %v788_v28 }
 0x198   : > { %v792_v33 = vadd.f32 %v791_v30, %v789_v29 }
 0x199   : > { %908 = vmatpush1.xpose.msra.mxu1 %v778_v8 }
 0x19a   : > { %793 = vadd.xlane.f32.xlu0 %v792_v33 }
 0x19c   : > { %942 = vmatmul.mubr.f32.vlgmr.msra.gmra.mxu1 %v778_v8 }
 0x19d   : > { %946 = vmatprep.mubr.f32.mxu1 %v781_v24 }
 0x1a0   : > { %947 = vmatmul.mubr.f32.gmra.mxu1 %v780_v16 }
 0x223   : > { %v794_v34 = vpop.xlane.xlu0 %793 }
 0x224   : > { %v795_v37 = vrot.slane %v794_v34, 4 }
 0x226   : > { %v796_v38 = vadd.f32 %v795_v37, %v794_v34 }
 0x228   : > { %v797_v35 = vrot.slane %v796_v38, 2 }
 0x22a   : > { %v798_v36 = vadd.f32 %v797_v35, %v796_v38 }
 0x22c   : > { %v799_v39 = vrot.slane %v798_v36, 1 }
 0x22e   : > { %v800_v40 = vadd.f32 %v799_v39, %v798_v36 }
 0x230   : > { %1073 = vpush %v800_v40 }
 0x23c   : > { %v868_v41 = vpop.f32.mrf.mxu0 }
 0x23e   : > { %v870_v42 = vpop.f32.mrf.mxu0 }
 0x240   : > { %v873_v13 = vpop.f32.mrf.mxu0 }
 0x242   : > { %v875_v45 = vpop.f32.mrf.mxu0 }
 0x25c   : > { %v943_v46 = vpop.f32.mrf.mxu1 }
 0x25d   : > { %v952_v47 = vsub.f32 %v868_v41, %v943_v46 }
 0x25e   : > { %v945_v48 = vpop.f32.mrf.mxu1 }
 0x25f   : > { %v954_v49 = vmul.f32 0.00024414063, %v952_v47 }
 0x260   : > { %v948_v50 = vpop.f32.mrf.mxu1 }
 0x261   : > { %v953_v57 = vsub.f32 %v873_v13, %v948_v50  ;;  %v956_v58 = vmul.f32 %v954_v49, %v954_v49  ;;  %s1074_s20 = spop %1073 }
 0x262   : > { %v950_v3 = vpop.f32.mrf.mxu1  ;;  %v981_v26 = vstv %s1074_s20 }
 0x263   : > { %v955_v51 = vmul.f32 0.00024414063, %v953_v57  ;;  %v958_v52 = vsel %vm252_vm6, %v956_v58, 0.0 }
 0x265   : > { %v957_v4 = vmul.f32 %v955_v51, %v955_v51 }
 0x267   : > { %v959_v53 = vsel %vm252_vm6, %v957_v4, 0.0 }
 0x268   : > { %v960_v5 = vadd.f32 %v959_v53, %v958_v52 }
 0x26a   : > { %961 = vadd.xlane.f32.xlu1 %v960_v5 }
 0x2f3   : > { %v962_v9 = vpop.xlane.xlu1 %961 }
 0x2f4   : > { %v963_v54 = vrot.slane %v962_v9, 4 }
 0x2f6   : > { %v964_v55 = vadd.f32 %v963_v54, %v962_v9 }
 0x2f8   : > { %v965_v56 = vrot.slane %v964_v55, 2 }
 0x2fa   : > { %v966_v59 = vadd.f32 %v965_v56, %v964_v55 }
 0x2fc   : > { %v967_v60 = vrot.slane %v966_v59, 1 }
 0x2fe   : > { %v968_v61 = vadd.f32 %v967_v60, %v966_v59 }
 0x300   : > { %1075 = vpush %v968_v61 }
 0x331   : > { %s1076_s21 = spop %1075 }
 0x332   : > { %v979_v62 = vstv %s1076_s21 }
 0x333   : > { %v980_v63 = vsel %vm978_vm13, %v979_v62, 0.0 }
 0x334   : > { %v982_v43 = vsel %vm976_vm14, %v981_v26, %v980_v63 }
 0x335   : > { %983 = vst [vmem:[%s215_s24] sm:$0xff] %v982_v43 }
 0x336 PF: > { %s14_s15 = sadd.s32 1, %s1102_s15  }
 0x337   : > { %p11_p4 = scmp.ge.s32.totalorder %s14_s15, 4  }
 0x339   :  { %13 = sbr.rel (!%p11_p4) target bundleno = 1 (0x1), region = 69 }

// kernel: _loss.2
= control target key start
LH: loop header
LB: loop body
LE: loop exit
PB: predicated region body
PF: predicated region fallthrough
CT: control target
= control target key end

     0   :  { %9 = vsyncpa [#allocation3], 0  ;;  %s8022_s0 = inlined_call_operand.hbm [shape: f32[8,16,16], index: 0, kind: input, shape index: {}]   ;;  %s8023_s1 = inlined_call_operand.hbm [shape: f32[8,16,16], index: 1, kind: input, shape index: {}]   ;;  %s8024_s2 = inlined_call_operand.vmem [shape: f32[6,16], index: 2, kind: input, shape index: {}]   ;;  %s8025_s3 = inlined_call_operand.vmem [shape: f32[16,6], index: 3, kind: input, shape index: {}]   ;;  %s8026_s4 = inlined_call_operand.vmem [shape: f32[1,8,128], index: 4, kind: output, shape index: {}]  }
   0x1   :  { %10 = vsyncpa [#allocation5], 0  ;;  %s7069_s15 = smov [#allocation2]  }
   0x2   :  { %s16_s16 = sshll.u32 %s7069_s15, 4  ;;  %s17_s16 = int_to_ptr.vmem [resolvable:$true] %s16_s16 }
   0x3   :  { %s7033_s17 = scalar_lea.vmem %s17_s16, 2048  ;;  %p7038_p1 = scmp.lt.s32.totalorder %s17_s16, %s17_s16 }
   0x4   :  { %p7034_p0 = scmp.ne.s32.totalorder %s17_s16, %s7033_s17  ;;  %p7039_p2 = scmp.lt.s32.totalorder %s7033_s17, %s7033_s17 }
   0x6   :  { %p7040_p3 = por %p7039_p2, %p7038_p1 }
   0x8   :  { %p7041_p4 = pnand %p7040_p3, %p7034_p0 }
   0xa   :  { %7044 = shalt.err (!%p7041_p4)
}
   0xb   :  { %s7070_s18 = smov 128   ;;  %s7071_s19 = smov 8  }
   0xc   :  { %22 = dma.hbm_to_vmem [thread:$0]  %s8022_s0, 2048, %s17_s16, [#allocation3], %s7070_s18, %s7070_s18, %s7071_s19  }
   0xd   :  { %s7072_s22 = smov [#allocation4]  }
   0xe   :  { %s28_s23 = sshll.u32 %s7072_s22, 4  ;;  %s29_s23 = int_to_ptr.vmem [resolvable:$true] %s28_s23 }
   0xf   :  { %s7053_s24 = scalar_lea.vmem %s29_s23, 2048  ;;  %p7058_p6 = scmp.lt.s32.totalorder %s29_s23, %s29_s23 }
  0x10   :  { %p7054_p5 = scmp.ne.s32.totalorder %s29_s23, %s7053_s24  ;;  %p7059_p7 = scmp.lt.s32.totalorder %s7053_s24, %s7053_s24 }
  0x12   :  { %p7060_p8 = por %p7059_p7, %p7058_p6 }
  0x14   :  { %p7061_p9 = pnand %p7060_p8, %p7054_p5 }
  0x16   :  { %7064 = shalt.err (!%p7061_p9)
}
  0x17   :  { %34 = dma.hbm_to_vmem [thread:$0]  %s8023_s1, 2048, %s29_s23, [#allocation5], %s7070_s18, %s7070_s18, %s7071_s19  }
  0x18   :  { %7065 = dma.done.wait [#allocation3], 2048  }
  0x19   :  { %7066 = vsyncadd [#allocation3], 4294965248 }
  0x1a   :  { %7067 = dma.done.wait [#allocation5], 2048  }
  0x1b   :  { %7068 = vsyncadd [#allocation5], 4294965248  ;;  %v7073_v0 = vmov 0.0   ;;  %vm7074_vm0 = vmmov 0   ;;  %v7112_v1 = vld [vmem:[#allocation2 + $0x8] sm:$0xff]  ;;  %v7114_v2 = vld [vmem:[#allocation2 + $0x18] sm:$0xff] }
  0x1c   :  { %6433 = vmatprep.subr.mxu0 %v7073_v0  ;;  %6440 = vmatprep.subr.mxu1 %v7073_v0  ;;  %v7116_v3 = vld [vmem:[#allocation2] sm:$0xff]  ;;  %v7120_v4 = vld [vmem:[#allocation2 + $0x10] sm:$0xff]  ;;  %vm109_vm1 = vcmask 130048   ;;  %v7131_v6 = vld [vmem:[#allocation2 + $0x28] sm:$0xff]  ;;  %vm6068_vm2 = vcmask 46080  }
  0x1d   :  { %6437 = vmatprep.mubr.msk.f32.mxu0 %vm7074_vm0, %v7073_v0  ;;  %6444 = vmatprep.mubr.msk.f32.mxu1 %vm7074_vm0, %v7073_v0  ;;  %v7125_v5 = vld [vmem:[%s8024_s2] sm:$0x3f]  ;;  %v7133_v7 = vld [vmem:[#allocation2 + $0x38] sm:$0xff]  ;;  %v7143_v9 = vld [vmem:[#allocation2 + $0x30] sm:$0xff] }
  0x1e   :  { %6434 = vmatpush3.msra.mxu0 %v7112_v1  ;;  %6441 = vmatpush3.msra.mxu1 %v7114_v2  ;;  %v7141_v8 = vld [vmem:[#allocation2 + $0x20] sm:$0xff]  ;;  %v7145_v10 = vld [vmem:[#allocation4 + $0x8] sm:$0xff]  ;;  %v7151_v12 = vld [vmem:[#allocation4 + $0x18] sm:$0xff] }
  0x1f   :  { %6435 = vmatprep.subr.mxu0 %v7073_v0  ;;  %6442 = vmatprep.subr.mxu1 %v7073_v0  ;;  %v78_v11 = vsub.f32 %v7112_v1, %v7145_v10  ;;  %v7153_v13 = vld [vmem:[#allocation4] sm:$0xff]  ;;  %v7155_v14 = vld [vmem:[#allocation4 + $0x10] sm:$0xff]  ;;  %v80_v15 = vsub.f32 %v7114_v2, %v7151_v12  ;;  %v7165_v18 = vld [vmem:[#allocation4 + $0x28] sm:$0xff] }
  0x20   :  { %6436 = vmatpush3.msra.mxu0 %v7116_v3  ;;  %6443 = vmatpush3.msra.mxu1 %v7120_v4  ;;  %v77_v16 = vsub.f32 %v7116_v3, %v7153_v13  ;;  %v79_v17 = vsub.f32 %v7120_v4, %v7155_v14  ;;  %v7167_v19 = vld [vmem:[#allocation4 + $0x38] sm:$0xff]  ;;  %v82_v21 = vsub.f32 %v7131_v6, %v7165_v18  ;;  %v7179_v23 = vld [vmem:[#allocation2 + $0x48] sm:$0xff]  ;;  %v7183_v28 = vld [vmem:[#allocation4 + $0x20] sm:$0xff] }
  0x21   :  { %6438 = vmatmul.mubr.msk.f32.vlgmr.msra.gmra.mxu0 %vm109_vm1, %v7125_v5  ;;  %6445 = vmatmul.mubr.msk.f32.vlgmr.msra.gmra.mxu1 %vm109_vm1, %v7125_v5  ;;  %v94_v20 = vmul.f32 %v78_v11, %v78_v11  ;;  %v84_v22 = vsub.f32 %v7133_v7, %v7167_v19  ;;  %v7181_v24 = vld [vmem:[#allocation2 + $0x58] sm:$0xff]  ;;  %v96_v25 = vmul.f32 %v80_v15, %v80_v15  ;;  %v7192_v31 = vld [vmem:[#allocation4 + $0x30] sm:$0xff]  ;;  %v7196_v32 = vld [vmem:[#allocation2 + $0x40] sm:$0xff] }
  0x22   :  { %6447 = vmatprep.subr.mxu0 %v7073_v0  ;;  %6454 = vmatprep.subr.mxu1 %v7073_v0  ;;  %v93_v26 = vmul.f32 %v77_v16, %v77_v16  ;;  %v95_v27 = vmul.f32 %v79_v17, %v79_v17  ;;  %v81_v30 = vsub.f32 %v7141_v8, %v7183_v28  ;;  %v7204_v36 = vld [vmem:[#allocation2 + $0x50] sm:$0xff]  ;;  %v7206_v39 = vld [vmem:[#allocation4 + $0x48] sm:$0xff]  ;;  %v7208_v40 = vld [vmem:[#allocation4 + $0x58] sm:$0xff] }
  0x23   :  { %6448 = vmatpush3.msra.mxu0 %v7131_v6  ;;  %6455 = vmatpush3.msra.mxu1 %v7133_v7  ;;  %v111_v29 = vsel %vm109_vm1, %v94_v20, 0.0  ;;  %v83_v35 = vsub.f32 %v7143_v9, %v7192_v31  ;;  %v115_v41 = vsel %vm109_vm1, %v96_v25, 0.0  ;;  %v98_v42 = vmul.f32 %v82_v21, %v82_v21  ;;  %v7221_v45 = vld [vmem:[#allocation4 + $0x40] sm:$0xff]  ;;  %v7223_v46 = vld [vmem:[#allocation4 + $0x50] sm:$0xff]  ;;  %v7241_v52 = vld [vmem:[#allocation2 + $0x68] sm:$0xff] }
  0x24   :  { %6449 = vmatprep.subr.mxu0 %v7073_v0  ;;  %6456 = vmatprep.subr.mxu1 %v7073_v0  ;;  %v110_v33 = vsel %vm109_vm1, %v93_v26, 0.0  ;;  %v113_v34 = vsel %vm109_vm1, %v95_v27, 0.0  ;;  %v97_v38 = vmul.f32 %v81_v30, %v81_v30  ;;  %v7215_v43 = vsub.f32 %v7179_v23, %v7206_v39  ;;  %v7228_v47 = vld [vmem:[#allocation2 + $0x60] sm:$0xff]  ;;  %v7243_v53 = vld [vmem:[#allocation2 + $0x78] sm:$0xff]  ;;  %v7259_v60 = vld [vmem:[#allocation2 + $0x70] sm:$0xff] }
  0x25   :  { %6450 = vmatpush3.msra.mxu0 %v7141_v8  ;;  %6451 = vmatprep.mubr.msk.f32.mxu0 %vm7074_vm0, %v7073_v0  ;;  %v112_v37 = vadd.f32 %v111_v29, %v110_v33  ;;  %v7219_v44 = vsub.f32 %v7181_v24, %v7208_v40  ;;  %v85_v49 = vsub.f32 %v7196_v32, %v7221_v45  ;;  %v7236_v51 = vld [vmem:[#allocation4 + $0x60] sm:$0xff]  ;;  %v119_v58 = vsel %vm109_vm1, %v98_v42, 0.0 }
  0x26   :  { %6457 = vmatpush3.msra.mxu1 %v7143_v9  ;;  %6458 = vmatprep.mubr.msk.f32.mxu1 %vm7074_vm0, %v7073_v0  ;;  %v7234_v50 = vsub.f32 %v7204_v36, %v7223_v46  ;;  %v117_v54 = vsel %vm109_vm1, %v97_v38, 0.0  ;;  %v99_v55 = vmul.f32 %v83_v35, %v83_v35  ;;  %v7248_v56 = vsub.f32 %v7228_v47, %v7236_v51 }
  0x27   :  { %6452 = vmatmul.mubr.msk.f32.vlgmr.msra.gmra.mxu0 %vm109_vm1, %v7125_v5  ;;  %6459 = vmatmul.mubr.msk.f32.vlgmr.msra.gmra.mxu1 %vm109_vm1, %v7125_v5  ;;  %v114_v48 = vadd.f32 %v113_v34, %v112_v37  ;;  %v100_v59 = vmul.f32 %v84_v22, %v84_v22  ;;  %v101_v63 = vmul.f32 %v85_v49, %v85_v49  ;;  %v7376_v49 = vld [vmem:[#allocation4 + $0x78] sm:$0xff] }
  0x28   :  { %6461 = vmatprep.subr.mxu0 %v7073_v0  ;;  %6468 = vmatprep.subr.mxu1 %v7073_v0  ;;  %v121_v62 = vsel %vm109_vm1, %v99_v55, 0.0  ;;  %v7282_v21 = vmul.f32 %v7145_v10, %v7112_v1  ;;  %v7286_v22 = vmul.f32 %v7151_v12, %v7114_v2  ;;  %v7292_v25 = vmul.f32 %v7153_v13, %v7116_v3 }
  0x29   :  { %6462 = vmatpush3.msra.mxu0 %v7179_v23  ;;  %6469 = vmatpush3.msra.mxu1 %v7181_v24  ;;  %v116_v57 = vadd.f32 %v115_v41, %v114_v48  ;;  %v123_v15 = vsel %vm109_vm1, %v100_v59, 0.0  ;;  %v125_v17 = vsel %vm109_vm1, %v101_v63, 0.0  ;;  %v7296_v26 = vmul.f32 %v7155_v14, %v7120_v4  ;;  %v7374_v48 = vld [vmem:[#allocation4 + $0x68] sm:$0xff] }
  0x2a   :  { %6463 = vmatprep.subr.mxu0 %v7073_v0  ;;  %6470 = vmatprep.subr.mxu1 %v7073_v0  ;;  %v7300_v27 = vmul.f32 %v7165_v18, %v7131_v6  ;;  %v7309_v30 = vmul.f32 %v7167_v19, %v7133_v7  ;;  %v7313_v33 = vmul.f32 %v7183_v28, %v7141_v8 }
  0x2b   :  { %6464 = vmatpush3.msra.mxu0 %v7196_v32  ;;  %6465 = vmatprep.mubr.msk.f32.mxu0 %vm7074_vm0, %v7073_v0  ;;  %v118_v61 = vadd.f32 %v117_v54, %v116_v57  ;;  %v7320_v34 = vmul.f32 %v7192_v31, %v7143_v9  ;;  %v7324_v35 = vmul.f32 %v7206_v39, %v7179_v23  ;;  %v7386_v54 = vld [vmem:[#allocation4 + $0x70] sm:$0xff] }
  0x2c   :  { %6471 = vmatpush3.msra.mxu1 %v7204_v36  ;;  %6472 = vmatprep.mubr.msk.f32.mxu1 %vm7074_vm0, %v7073_v0  ;;  %v7328_v37 = vmul.f32 %v7208_v40, %v7181_v24  ;;  %v7336_v38 = vmul.f32 %v7221_v45, %v7196_v32  ;;  %v7340_v41 = vmul.f32 %v7223_v46, %v7204_v36 }
  0x2d   :  { %6466 = vmatmul.mubr.msk.f32.vlgmr.msra.gmra.mxu0 %vm109_vm1, %v7125_v5  ;;  %6473 = vmatmul.mubr.msk.f32.vlgmr.msra.gmra.mxu1 %vm109_vm1, %v7125_v5  ;;  %v120_v11 = vadd.f32 %v119_v58, %v118_v61  ;;  %v7346_v42 = vmul.f32 %v7236_v51, %v7228_v47  ;;  %v151_v55 = vmul.f32 %v7112_v1, %v7112_v1 }
  0x2e   :  { %6475 = vmatprep.subr.mxu0 %v7073_v0  ;;  %6482 = vmatprep.subr.mxu1 %v7073_v0  ;;  %v153_v57 = vmul.f32 %v7114_v2, %v7114_v2  ;;  %v150_v58 = vmul.f32 %v7116_v3, %v7116_v3  ;;  %v152_v1 = vmul.f32 %v7120_v4, %v7120_v4 }
  0x2f   :  { %6476 = vmatpush3.msra.mxu0 %v7241_v52  ;;  %6483 = vmatpush3.msra.mxu1 %v7243_v53  ;;  %v122_v16 = vadd.f32 %v121_v62, %v120_v11  ;;  %v155_v2 = vmul.f32 %v7131_v6, %v7131_v6  ;;  %v157_v3 = vmul.f32 %v7133_v7, %v7133_v7 }
  0x30   :  { %6477 = vmatprep.subr.mxu0 %v7073_v0  ;;  %6484 = vmatprep.subr.mxu1 %v7073_v0  ;;  %v154_v4 = vmul.f32 %v7141_v8, %v7141_v8  ;;  %v156_v6 = vmul.f32 %v7143_v9, %v7143_v9  ;;  %v159_v7 = vmul.f32 %v7179_v23, %v7179_v23 }
  0x31   :  { %6478 = vmatpush3.msra.mxu0 %v7228_v47  ;;  %6479 = vmatprep.mubr.msk.f32.mxu0 %vm7074_vm0, %v7073_v0  ;;  %v124_v20 = vadd.f32 %v123_v15, %v122_v16  ;;  %v161_v8 = vmul.f32 %v7181_v24, %v7181_v24  ;;  %v158_v9 = vmul.f32 %v7196_v32, %v7196_v32 }
  0x32   :  { %6485 = vmatpush3.msra.mxu1 %v7259_v60  ;;  %6486 = vmatprep.mubr.msk.f32.mxu1 %vm7074_vm0, %v7073_v0  ;;  %v160_v23 = vmul.f32 %v7204_v36, %v7204_v36  ;;  %v163_v24 = vmul.f32 %v7241_v52, %v7241_v52  ;;  %v165_v32 = vmul.f32 %v7243_v53, %v7243_v53 }
  0x33   :  { %6480 = vmatmul.mubr.msk.f32.vlgmr.msra.gmra.mxu0 %vm109_vm1, %v7125_v5  ;;  %6487 = vmatmul.mubr.msk.f32.vlgmr.msra.gmra.mxu1 %vm109_vm1, %v7125_v5  ;;  %v7305_v29 = vadd.f32 %v125_v17, %v124_v20  ;;  %v162_v36 = vmul.f32 %v7228_v47, %v7228_v47  ;;  %v164_v59 = vmul.f32 %v7259_v60, %v7259_v60 }
  0x34   :  { %6489 = vmatprep.subr.mxu0 %v7073_v0  ;;  %6496 = vmatprep.subr.mxu1 %v7073_v0  ;;  %v167_v47 = vmul.f32 %v7145_v10, %v7145_v10  ;;  %v169_v61 = vmul.f32 %v7151_v12, %v7151_v12  ;;  %v166_v62 = vmul.f32 %v7153_v13, %v7153_v13 }
  0x35   :  { %6490 = vmatpush3.msra.mxu0 %v7145_v10  ;;  %6497 = vmatpush3.msra.mxu1 %v7151_v12  ;;  %v168_v10 = vmul.f32 %v7155_v14, %v7155_v14  ;;  %v171_v12 = vmul.f32 %v7165_v18, %v7165_v18  ;;  %v180_v63 = vmul.f32 %v7386_v54, %v7386_v54 }
  0x36   :  { %6491 = vmatprep.subr.mxu0 %v7073_v0  ;;  %6498 = vmatprep.subr.mxu1 %v7073_v0  ;;  %v197_v11 = vmul.f32 %v7376_v49, %v7243_v53  ;;  %v7626_v53 = vld [vmem:[%s8025_s3 + $0x8] sm:$0xff] }
  0x37   :  { %6492 = vmatpush3.msra.mxu0 %v7153_v13  ;;  %6493 = vmatprep.mubr.msk.f32.mxu0 %vm7074_vm0, %v7073_v0  ;;  %v173_v13 = vmul.f32 %v7167_v19, %v7167_v19 }
  0x38   :  { %6499 = vmatpush3.msra.mxu1 %v7155_v14  ;;  %6500 = vmatprep.mubr.msk.f32.mxu1 %vm7074_vm0, %v7073_v0  ;;  %v170_v14 = vmul.f32 %v7183_v28, %v7183_v28 }
  0x39   :  { %6494 = vmatmul.mubr.msk.f32.vlgmr.msra.gmra.mxu0 %vm109_vm1, %v7125_v5  ;;  %6501 = vmatmul.mubr.msk.f32.vlgmr.msra.gmra.mxu1 %vm109_vm1, %v7125_v5 }
  0x3a   :  { %6503 = vmatprep.subr.mxu0 %v7073_v0  ;;  %6510 = vmatprep.subr.mxu1 %v7073_v0 }
  0x3b   :  { %6504 = vmatpush3.msra.mxu0 %v7165_v18  ;;  %6511 = vmatpush3.msra.mxu1 %v7167_v19  ;;  %v172_v18 = vmul.f32 %v7192_v31, %v7192_v31  ;;  %v175_v19 = vmul.f32 %v7206_v39, %v7206_v39 }
  0x3c   :  { %6505 = vmatprep.subr.mxu0 %v7073_v0  ;;  %6512 = vmatprep.subr.mxu1 %v7073_v0 }
  0x3d   :  { %6506 = vmatpush3.msra.mxu0 %v7183_v28  ;;  %6507 = vmatprep.mubr.msk.f32.mxu0 %vm7074_vm0, %v7073_v0  ;;  %v177_v28 = vmul.f32 %v7208_v40, %v7208_v40 }
  0x3e   :  { %6513 = vmatpush3.msra.mxu1 %v7192_v31  ;;  %6514 = vmatprep.mubr.msk.f32.mxu1 %vm7074_vm0, %v7073_v0  ;;  %v174_v31 = vmul.f32 %v7221_v45, %v7221_v45 }
  0x3f   :  { %6508 = vmatmul.mubr.msk.f32.vlgmr.msra.gmra.mxu0 %vm109_vm1, %v7125_v5  ;;  %6515 = vmatmul.mubr.msk.f32.vlgmr.msra.gmra.mxu1 %vm109_vm1, %v7125_v5 }
  0x40   :  { %6517 = vmatprep.subr.mxu0 %v7073_v0  ;;  %6524 = vmatprep.subr.mxu1 %v7073_v0 }
  0x41   :  { %6518 = vmatpush3.msra.mxu0 %v7206_v39  ;;  %6525 = vmatpush3.msra.mxu1 %v7208_v40  ;;  %v176_v39 = vmul.f32 %v7223_v46, %v7223_v46  ;;  %v179_v40 = vmul.f32 %v7374_v48, %v7374_v48 }
  0x42   :  { %6519 = vmatprep.subr.mxu0 %v7073_v0  ;;  %6526 = vmatprep.subr.mxu1 %v7073_v0 }
  0x43   :  { %6520 = vmatpush3.msra.mxu0 %v7221_v45  ;;  %6521 = vmatprep.mubr.msk.f32.mxu0 %vm7074_vm0, %v7073_v0  ;;  %v181_v45 = vmul.f32 %v7376_v49, %v7376_v49 }
  0x44   :  { %6527 = vmatpush3.msra.mxu1 %v7223_v46  ;;  %6528 = vmatprep.mubr.msk.f32.mxu1 %vm7074_vm0, %v7073_v0  ;;  %v178_v46 = vmul.f32 %v7236_v51, %v7236_v51 }
  0x45   :  { %6522 = vmatmul.mubr.msk.f32.vlgmr.msra.gmra.mxu0 %vm109_vm1, %v7125_v5  ;;  %6529 = vmatmul.mubr.msk.f32.vlgmr.msra.gmra.mxu1 %vm109_vm1, %v7125_v5 }
  0x46   :  { %6531 = vmatprep.subr.mxu0 %v7073_v0  ;;  %6538 = vmatprep.subr.mxu1 %v7073_v0 }
  0x47   :  { %6532 = vmatpush3.msra.mxu0 %v7374_v48  ;;  %6539 = vmatpush3.msra.mxu1 %v7376_v49 }
  0x48   :  { %6533 = vmatprep.subr.mxu0 %v7073_v0  ;;  %6540 = vmatprep.subr.mxu1 %v7073_v0 }
  0x49   :  { %6534 = vmatpush3.msra.mxu0 %v7236_v51  ;;  %6535 = vmatprep.mubr.msk.f32.mxu0 %vm7074_vm0, %v7073_v0  ;;  %v195_v51 = vmul.f32 %v7374_v48, %v7241_v52  ;;  %v196_v52 = vmul.f32 %v7386_v54, %v7259_v60  ;;  %v7637_v60 = vld [vmem:[%s8025_s3] sm:$0xff] }
  0x4a   :  { %6541 = vmatpush3.msra.mxu1 %v7386_v54  ;;  %6542 = vmatprep.mubr.msk.f32.mxu1 %vm7074_vm0, %v7073_v0 }
  0x4b   :  { %6536 = vmatmul.mubr.msk.f32.vlgmr.msra.gmra.mxu0 %vm109_vm1, %v7125_v5  ;;  %6543 = vmatmul.mubr.msk.f32.vlgmr.msra.gmra.mxu1 %vm109_vm1, %v7125_v5 }
  0x4c   :  { %6545 = vmatprep.subr.mxu0 %v7073_v0  ;;  %6552 = vmatprep.subr.mxu1 %v7073_v0 }
  0x4d   :  { %6546 = vmatpush3.msra.mxu0 %v151_v55  ;;  %6553 = vmatpush3.msra.mxu1 %v153_v57 }
  0x4e   :  { %6547 = vmatprep.subr.mxu0 %v7073_v0  ;;  %6554 = vmatprep.subr.mxu1 %v7073_v0 }
  0x4f   :  { %6548 = vmatpush3.msra.mxu0 %v150_v58  ;;  %6549 = vmatprep.mubr.msk.f32.mxu0 %vm7074_vm0, %v7073_v0 }
  0x50   :  { %6555 = vmatpush3.msra.mxu1 %v152_v1  ;;  %6556 = vmatprep.mubr.msk.f32.mxu1 %vm7074_vm0, %v7073_v0 }
  0x51   :  { %6550 = vmatmul.mubr.msk.f32.vlgmr.msra.gmra.mxu0 %vm109_vm1, %v7125_v5  ;;  %6557 = vmatmul.mubr.msk.f32.vlgmr.msra.gmra.mxu1 %vm109_vm1, %v7125_v5 }
  0x52   :  { %6559 = vmatprep.subr.mxu0 %v7073_v0  ;;  %6566 = vmatprep.subr.mxu1 %v7073_v0 }
  0x53   :  { %6560 = vmatpush3.msra.mxu0 %v155_v2  ;;  %6567 = vmatpush3.msra.mxu1 %v157_v3 }
  0x54   :  { %6561 = vmatprep.subr.mxu0 %v7073_v0  ;;  %6568 = vmatprep.subr.mxu1 %v7073_v0 }
  0x55   :  { %6562 = vmatpush3.msra.mxu0 %v154_v4  ;;  %6563 = vmatprep.mubr.msk.f32.mxu0 %vm7074_vm0, %v7073_v0 }
  0x56   :  { %6569 = vmatpush3.msra.mxu1 %v156_v6  ;;  %6570 = vmatprep.mubr.msk.f32.mxu1 %vm7074_vm0, %v7073_v0 }
  0x57   :  { %6564 = vmatmul.mubr.msk.f32.vlgmr.msra.gmra.mxu0 %vm109_vm1, %v7125_v5  ;;  %6571 = vmatmul.mubr.msk.f32.vlgmr.msra.gmra.mxu1 %vm109_vm1, %v7125_v5 }
  0x58   :  { %6573 = vmatprep.subr.mxu0 %v7073_v0  ;;  %6580 = vmatprep.subr.mxu1 %v7073_v0 }
  0x59   :  { %6574 = vmatpush3.msra.mxu0 %v159_v7  ;;  %6581 = vmatpush3.msra.mxu1 %v161_v8 }
  0x5a   :  { %6575 = vmatprep.subr.mxu0 %v7073_v0  ;;  %6582 = vmatprep.subr.mxu1 %v7073_v0 }
  0x5b   :  { %6576 = vmatpush3.msra.mxu0 %v158_v9  ;;  %6577 = vmatprep.mubr.msk.f32.mxu0 %vm7074_vm0, %v7073_v0 }
  0x5c   :  { %6583 = vmatpush3.msra.mxu1 %v160_v23  ;;  %6584 = vmatprep.mubr.msk.f32.mxu1 %vm7074_vm0, %v7073_v0 }
  0x5d   :  { %6578 = vmatmul.mubr.msk.f32.vlgmr.msra.gmra.mxu0 %vm109_vm1, %v7125_v5  ;;  %6585 = vmatmul.mubr.msk.f32.vlgmr.msra.gmra.mxu1 %vm109_vm1, %v7125_v5 }
  0x5e   :  { %6587 = vmatprep.subr.mxu0 %v7073_v0  ;;  %6594 = vmatprep.subr.mxu1 %v7073_v0 }
  0x5f   :  { %6588 = vmatpush3.msra.mxu0 %v163_v24  ;;  %6595 = vmatpush3.msra.mxu1 %v165_v32 }
  0x60   :  { %6589 = vmatprep.subr.mxu0 %v7073_v0  ;;  %6596 = vmatprep.subr.mxu1 %v7073_v0 }
  0x61   :  { %6590 = vmatpush3.msra.mxu0 %v162_v36  ;;  %6591 = vmatprep.mubr.msk.f32.mxu0 %vm7074_vm0, %v7073_v0 }
  0x62   :  { %6597 = vmatpush3.msra.mxu1 %v164_v59  ;;  %6598 = vmatprep.mubr.msk.f32.mxu1 %vm7074_vm0, %v7073_v0 }
  0x63   :  { %6592 = vmatmul.mubr.msk.f32.vlgmr.msra.gmra.mxu0 %vm109_vm1, %v7125_v5  ;;  %6599 = vmatmul.mubr.msk.f32.vlgmr.msra.gmra.mxu1 %vm109_vm1, %v7125_v5 }
  0x64   :  { %6601 = vmatprep.subr.mxu0 %v7073_v0  ;;  %6608 = vmatprep.subr.mxu1 %v7073_v0 }
  0x65   :  { %6602 = vmatpush3.msra.mxu0 %v167_v47  ;;  %6609 = vmatpush3.msra.mxu1 %v169_v61 }
  0x66   :  { %6603 = vmatprep.subr.mxu0 %v7073_v0  ;;  %6610 = vmatprep.subr.mxu1 %v7073_v0 }
  0x67   :  { %6604 = vmatpush3.msra.mxu0 %v166_v62  ;;  %6605 = vmatprep.mubr.msk.f32.mxu0 %vm7074_vm0, %v7073_v0 }
  0x68   :  { %6611 = vmatpush3.msra.mxu1 %v168_v10  ;;  %6612 = vmatprep.mubr.msk.f32.mxu1 %vm7074_vm0, %v7073_v0 }
  0x69   :  { %6606 = vmatmul.mubr.msk.f32.vlgmr.msra.gmra.mxu0 %vm109_vm1, %v7125_v5  ;;  %6613 = vmatmul.mubr.msk.f32.vlgmr.msra.gmra.mxu1 %vm109_vm1, %v7125_v5 }
  0x6a   :  { %6615 = vmatprep.subr.mxu0 %v7073_v0  ;;  %6622 = vmatprep.subr.mxu1 %v7073_v0 }
  0x6b   :  { %6616 = vmatpush3.msra.mxu0 %v171_v12  ;;  %6623 = vmatpush3.msra.mxu1 %v173_v13 }
  0x6c   :  { %6617 = vmatprep.subr.mxu0 %v7073_v0  ;;  %6624 = vmatprep.subr.mxu1 %v7073_v0 }
  0x6d   :  { %6618 = vmatpush3.msra.mxu0 %v170_v14  ;;  %6619 = vmatprep.mubr.msk.f32.mxu0 %vm7074_vm0, %v7073_v0 }
  0x6e   :  { %6625 = vmatpush3.msra.mxu1 %v172_v18  ;;  %6626 = vmatprep.mubr.msk.f32.mxu1 %vm7074_vm0, %v7073_v0 }
  0x6f   :  { %6620 = vmatmul.mubr.msk.f32.vlgmr.msra.gmra.mxu0 %vm109_vm1, %v7125_v5  ;;  %6627 = vmatmul.mubr.msk.f32.vlgmr.msra.gmra.mxu1 %vm109_vm1, %v7125_v5 }
  0x70   :  { %6629 = vmatprep.subr.mxu0 %v7073_v0  ;;  %6636 = vmatprep.subr.mxu1 %v7073_v0 }
  0x71   :  { %6630 = vmatpush3.msra.mxu0 %v175_v19  ;;  %6637 = vmatpush3.msra.mxu1 %v177_v28 }
  0x72   :  { %6631 = vmatprep.subr.mxu0 %v7073_v0  ;;  %6638 = vmatprep.subr.mxu1 %v7073_v0 }
  0x73   :  { %6632 = vmatpush3.msra.mxu0 %v174_v31  ;;  %6633 = vmatprep.mubr.msk.f32.mxu0 %vm7074_vm0, %v7073_v0 }
  0x74   :  { %6639 = vmatpush3.msra.mxu1 %v176_v39  ;;  %6640 = vmatprep.mubr.msk.f32.mxu1 %vm7074_vm0, %v7073_v0 }
  0x75   :  { %6634 = vmatmul.mubr.msk.f32.vlgmr.msra.gmra.mxu0 %vm109_vm1, %v7125_v5  ;;  %6641 = vmatmul.mubr.msk.f32.vlgmr.msra.gmra.mxu1 %vm109_vm1, %v7125_v5 }
  0x76   :  { %6643 = vmatprep.subr.mxu0 %v7073_v0  ;;  %6650 = vmatprep.subr.mxu1 %v7073_v0 }
  0x77   :  { %6644 = vmatpush3.msra.mxu0 %v179_v40  ;;  %6651 = vmatpush3.msra.mxu1 %v181_v45 }
  0x78   :  { %6645 = vmatprep.subr.mxu0 %v7073_v0  ;;  %6652 = vmatprep.subr.mxu1 %v7073_v0 }
  0x79   :  { %6646 = vmatpush3.msra.mxu0 %v178_v46  ;;  %6647 = vmatprep.mubr.msk.f32.mxu0 %vm7074_vm0, %v7073_v0 }
  0x7a   :  { %6653 = vmatpush3.msra.mxu1 %v180_v63  ;;  %6654 = vmatprep.mubr.msk.f32.mxu1 %vm7074_vm0, %v7073_v0 }
  0x7b   :  { %6648 = vmatmul.mubr.msk.f32.vlgmr.msra.gmra.mxu0 %vm109_vm1, %v7125_v5  ;;  %6655 = vmatmul.mubr.msk.f32.vlgmr.msra.gmra.mxu1 %vm109_vm1, %v7125_v5 }
  0x7c   :  { %6657 = vmatprep.subr.mxu0 %v7073_v0  ;;  %6664 = vmatprep.subr.mxu1 %v7073_v0 }
  0x7d   :  { %6658 = vmatpush3.msra.mxu0 %v7282_v21  ;;  %6665 = vmatpush3.msra.mxu1 %v7286_v22 }
  0x7e   :  { %6659 = vmatprep.subr.mxu0 %v7073_v0  ;;  %6666 = vmatprep.subr.mxu1 %v7073_v0 }
  0x7f   :  { %6660 = vmatpush3.msra.mxu0 %v7292_v25  ;;  %6661 = vmatprep.mubr.msk.f32.mxu0 %vm7074_vm0, %v7073_v0 }
  0x80   :  { %6667 = vmatpush3.msra.mxu1 %v7296_v26  ;;  %6668 = vmatprep.mubr.msk.f32.mxu1 %vm7074_vm0, %v7073_v0 }
  0x81   :  { %6662 = vmatmul.mubr.msk.f32.vlgmr.msra.gmra.mxu0 %vm109_vm1, %v7125_v5  ;;  %6669 = vmatmul.mubr.msk.f32.vlgmr.msra.gmra.mxu1 %vm109_vm1, %v7125_v5 }
  0x82   :  { %6671 = vmatprep.subr.mxu0 %v7073_v0  ;;  %6678 = vmatprep.subr.mxu1 %v7073_v0 }
  0x83   :  { %6672 = vmatpush3.msra.mxu0 %v7300_v27  ;;  %6679 = vmatpush3.msra.mxu1 %v7309_v30 }
  0x84   :  { %6673 = vmatprep.subr.mxu0 %v7073_v0  ;;  %6680 = vmatprep.subr.mxu1 %v7073_v0 }
  0x85   :  { %6674 = vmatpush3.msra.mxu0 %v7313_v33  ;;  %6675 = vmatprep.mubr.msk.f32.mxu0 %vm7074_vm0, %v7073_v0 }
  0x86   :  { %6681 = vmatpush3.msra.mxu1 %v7320_v34  ;;  %6682 = vmatprep.mubr.msk.f32.mxu1 %vm7074_vm0, %v7073_v0 }
  0x87   :  { %6676 = vmatmul.mubr.msk.f32.vlgmr.msra.gmra.mxu0 %vm109_vm1, %v7125_v5  ;;  %6683 = vmatmul.mubr.msk.f32.vlgmr.msra.gmra.mxu1 %vm109_vm1, %v7125_v5 }
  0x88   :  { %6685 = vmatprep.subr.mxu0 %v7073_v0  ;;  %6692 = vmatprep.subr.mxu1 %v7073_v0 }
  0x89   :  { %6686 = vmatpush3.msra.mxu0 %v7324_v35  ;;  %6693 = vmatpush3.msra.mxu1 %v7328_v37 }
  0x8a   :  { %6687 = vmatprep.subr.mxu0 %v7073_v0  ;;  %6694 = vmatprep.subr.mxu1 %v7073_v0 }
  0x8b   :  { %6688 = vmatpush3.msra.mxu0 %v7336_v38  ;;  %6689 = vmatprep.mubr.msk.f32.mxu0 %vm7074_vm0, %v7073_v0 }
  0x8c   :  { %6695 = vmatpush3.msra.mxu1 %v7340_v41  ;;  %6696 = vmatprep.mubr.msk.f32.mxu1 %vm7074_vm0, %v7073_v0 }
  0x8d   :  { %6690 = vmatmul.mubr.msk.f32.vlgmr.msra.gmra.mxu0 %vm109_vm1, %v7125_v5  ;;  %6697 = vmatmul.mubr.msk.f32.vlgmr.msra.gmra.mxu1 %vm109_vm1, %v7125_v5 }
  0x8e   :  { %6699 = vmatprep.subr.mxu0 %v7073_v0  ;;  %6706 = vmatprep.subr.mxu1 %v7073_v0 }
  0x8f   :  { %6700 = vmatpush3.msra.mxu0 %v195_v51  ;;  %6707 = vmatpush3.msra.mxu1 %v197_v11 }
  0x90   :  { %6701 = vmatprep.subr.mxu0 %v7073_v0  ;;  %6708 = vmatprep.subr.mxu1 %v7073_v0 }
  0x91   :  { %6702 = vmatpush3.msra.mxu0 %v7346_v42  ;;  %6703 = vmatprep.mubr.msk.f32.mxu0 %vm7074_vm0, %v7073_v0 }
  0x92   :  { %6709 = vmatpush3.msra.mxu1 %v196_v52  ;;  %6710 = vmatprep.mubr.msk.f32.mxu1 %vm7074_vm0, %v7073_v0 }
  0x93   :  { %6704 = vmatmul.mubr.msk.f32.vlgmr.msra.gmra.mxu0 %vm109_vm1, %v7125_v5  ;;  %6711 = vmatmul.mubr.msk.f32.vlgmr.msra.gmra.mxu1 %vm109_vm1, %v7125_v5 }
  0x94   :  { %6713 = vmatprep.subr.mxu0 %v7073_v0  ;;  %6720 = vmatprep.subr.mxu1 %v7073_v0 }
  0x95   :  { %6714 = vmatpush3.msra.mxu0 %v7626_v53  ;;  %6721 = vmatpush3.msra.mxu1 %v7626_v53 }
  0x96   :  { %6715 = vmatprep.subr.mxu0 %v7073_v0  ;;  %6722 = vmatprep.subr.mxu1 %v7073_v0 }
  0x97   :  { %6716 = vmatpush3.msra.mxu0 %v7637_v60  ;;  %6717 = vmatprep.mubr.msk.f32.mxu0 %vm7074_vm0, %v7073_v0 }
  0x98   :  { %6723 = vmatpush3.msra.mxu1 %v7637_v60  ;;  %6724 = vmatprep.mubr.msk.f32.mxu1 %vm7074_vm0, %v7073_v0 }
  0x99   :  { %6727 = vmatprep.subr.mxu0 %v7073_v0  ;;  %6734 = vmatprep.subr.mxu1 %v7073_v0 }
  0xe1   :  { %v270_v5 = vpop.f32.mrf.mxu0  ;;  %v340_v15 = vpop.f32.mrf.mxu1 }
  0xe2   :  { %6718 = vmatmul.mubr.msk.f32.vlgmr.msra.gmra.mxu0 %vm109_vm1, %v270_v5  ;;  %6725 = vmatmul.mubr.msk.f32.vlgmr.msra.gmra.mxu1 %vm109_vm1, %v340_v15 }
  0xe3   :  { %v6439_v16 = vpop.f32.mrf.mxu0  ;;  %v6446_v17 = vpop.f32.mrf.mxu1  ;;  %6728 = vmatpush3.msra.mxu0 %v7626_v53  ;;  %6735 = vmatpush3.msra.mxu1 %v7626_v53 }
  0xe4   :  { %6729 = vmatprep.subr.mxu0 %v7073_v0  ;;  %6736 = vmatprep.subr.mxu1 %v7073_v0 }
  0xe5   :  { %6730 = vmatpush3.msra.mxu0 %v7637_v60  ;;  %6731 = vmatprep.mubr.msk.f32.mxu0 %vm7074_vm0, %v7073_v0 }
  0xe6   :  { %6737 = vmatpush3.msra.mxu1 %v7637_v60  ;;  %6738 = vmatprep.mubr.msk.f32.mxu1 %vm7074_vm0, %v7073_v0 }
  0xe7   :  { %v410_v20 = vpop.f32.mrf.mxu0  ;;  %v480_v21 = vpop.f32.mrf.mxu1  ;;  %6741 = vmatprep.subr.mxu0 %v7073_v0  ;;  %6748 = vmatprep.subr.mxu1 %v7073_v0 }
  0xe8   :  { %6732 = vmatmul.mubr.msk.f32.vlgmr.msra.gmra.mxu0 %vm109_vm1, %v410_v20  ;;  %6739 = vmatmul.mubr.msk.f32.vlgmr.msra.gmra.mxu1 %vm109_vm1, %v480_v21 }
  0xe9   :  { %v6453_v22 = vpop.f32.mrf.mxu0  ;;  %v6460_v25 = vpop.f32.mrf.mxu1  ;;  %6742 = vmatpush3.msra.mxu0 %v7626_v53  ;;  %6749 = vmatpush3.msra.mxu1 %v7626_v53 }
  0xea   :  { %6743 = vmatprep.subr.mxu0 %v7073_v0  ;;  %6750 = vmatprep.subr.mxu1 %v7073_v0 }
  0xeb   :  { %6744 = vmatpush3.msra.mxu0 %v7637_v60  ;;  %6745 = vmatprep.mubr.msk.f32.mxu0 %vm7074_vm0, %v7073_v0 }
  0xec   :  { %6751 = vmatpush3.msra.mxu1 %v7637_v60  ;;  %6752 = vmatprep.mubr.msk.f32.mxu1 %vm7074_vm0, %v7073_v0 }
  0xed   :  { %v550_v26 = vpop.f32.mrf.mxu0  ;;  %v620_v27 = vpop.f32.mrf.mxu1  ;;  %6755 = vmatprep.subr.mxu0 %v7073_v0  ;;  %6762 = vmatprep.subr.mxu1 %v7073_v0 }
  0xee   :  { %6746 = vmatmul.mubr.msk.f32.vlgmr.msra.gmra.mxu0 %vm109_vm1, %v550_v26  ;;  %6753 = vmatmul.mubr.msk.f32.vlgmr.msra.gmra.mxu1 %vm109_vm1, %v620_v27 }
  0xef   :  { %v6467_v30 = vpop.f32.mrf.mxu0  ;;  %v6474_v33 = vpop.f32.mrf.mxu1  ;;  %6756 = vmatpush3.msra.mxu0 %v7626_v53  ;;  %6763 = vmatpush3.msra.mxu1 %v7626_v53 }
  0xf0   :  { %6757 = vmatprep.subr.mxu0 %v7073_v0  ;;  %6764 = vmatprep.subr.mxu1 %v7073_v0 }
  0xf1   :  { %6758 = vmatpush3.msra.mxu0 %v7637_v60  ;;  %6759 = vmatprep.mubr.msk.f32.mxu0 %vm7074_vm0, %v7073_v0 }
  0xf2   :  { %6765 = vmatpush3.msra.mxu1 %v7637_v60  ;;  %6766 = vmatprep.mubr.msk.f32.mxu1 %vm7074_vm0, %v7073_v0 }
  0xf3   :  { %v690_v34 = vpop.f32.mrf.mxu0  ;;  %v760_v35 = vpop.f32.mrf.mxu1  ;;  %6769 = vmatprep.subr.mxu0 %v7073_v0  ;;  %6776 = vmatprep.subr.mxu1 %v7073_v0 }
  0xf4   :  { %6760 = vmatmul.mubr.msk.f32.vlgmr.msra.gmra.mxu0 %vm109_vm1, %v690_v34  ;;  %6767 = vmatmul.mubr.msk.f32.vlgmr.msra.gmra.mxu1 %vm109_vm1, %v760_v35 }
  0xf5   :  { %v6481_v37 = vpop.f32.mrf.mxu0  ;;  %v6488_v38 = vpop.f32.mrf.mxu1  ;;  %6770 = vmatpush3.msra.mxu0 %v7626_v53  ;;  %6777 = vmatpush3.msra.mxu1 %v7626_v53 }
  0xf6   :  { %6771 = vmatprep.subr.mxu0 %v7073_v0  ;;  %6778 = vmatprep.subr.mxu1 %v7073_v0 }
  0xf7   :  { %6772 = vmatpush3.msra.mxu0 %v7637_v60  ;;  %6773 = vmatprep.mubr.msk.f32.mxu0 %vm7074_vm0, %v7073_v0 }
  0xf8   :  { %6779 = vmatpush3.msra.mxu1 %v7637_v60  ;;  %6780 = vmatprep.mubr.msk.f32.mxu1 %vm7074_vm0, %v7073_v0 }
  0xf9   :  { %v830_v41 = vpop.f32.mrf.mxu0  ;;  %v900_v42 = vpop.f32.mrf.mxu1  ;;  %6783 = vmatprep.subr.mxu0 %v7073_v0  ;;  %6790 = vmatprep.subr.mxu1 %v7073_v0 }
  0xfa   :  { %6774 = vmatmul.mubr.msk.f32.vlgmr.msra.gmra.mxu0 %vm109_vm1, %v830_v41  ;;  %6781 = vmatmul.mubr.msk.f32.vlgmr.msra.gmra.mxu1 %vm109_vm1, %v900_v42 }
  0xfb   :  { %v6495_v48 = vpop.f32.mrf.mxu0  ;;  %v6502_v49 = vpop.f32.mrf.mxu1  ;;  %6784 = vmatpush3.msra.mxu0 %v7626_v53  ;;  %6791 = vmatpush3.msra.mxu1 %v7626_v53 }
  0xfc   :  { %6785 = vmatprep.subr.mxu0 %v7073_v0  ;;  %6792 = vmatprep.subr.mxu1 %v7073_v0 }
  0xfd   :  { %6786 = vmatpush3.msra.mxu0 %v7637_v60  ;;  %6787 = vmatprep.mubr.msk.f32.mxu0 %vm7074_vm0, %v7073_v0 }
  0xfe   :  { %6793 = vmatpush3.msra.mxu1 %v7637_v60  ;;  %6794 = vmatprep.mubr.msk.f32.mxu1 %vm7074_vm0, %v7073_v0 }
  0xff   :  { %v970_v54 = vpop.f32.mrf.mxu0  ;;  %v1040_v55 = vpop.f32.mrf.mxu1  ;;  %6797 = vmatprep.subr.mxu0 %v7073_v0  ;;  %6804 = vmatprep.subr.mxu1 %v7073_v0 }
 0x100   :  { %6788 = vmatmul.mubr.msk.f32.vlgmr.msra.gmra.mxu0 %vm109_vm1, %v970_v54  ;;  %6795 = vmatmul.mubr.msk.f32.vlgmr.msra.gmra.mxu1 %vm109_vm1, %v1040_v55 }
 0x101   :  { %v6509_v57 = vpop.f32.mrf.mxu0  ;;  %v6516_v58 = vpop.f32.mrf.mxu1  ;;  %6798 = vmatpush3.msra.mxu0 %v7626_v53  ;;  %6805 = vmatpush3.msra.mxu1 %v7626_v53 }
 0x102   :  { %6799 = vmatprep.subr.mxu0 %v7073_v0  ;;  %6806 = vmatprep.subr.mxu1 %v7073_v0  ;;  %v102_v58 = vmul.f32 %v7215_v43, %v7215_v43 }
 0x103   :  { %6800 = vmatpush3.msra.mxu0 %v7637_v60  ;;  %6801 = vmatprep.mubr.msk.f32.mxu0 %vm7074_vm0, %v7073_v0 }
 0x104   :  { %6807 = vmatpush3.msra.mxu1 %v7637_v60  ;;  %6808 = vmatprep.mubr.msk.f32.mxu1 %vm7074_vm0, %v7073_v0 }
 0x105   :  { %v1110_v1 = vpop.f32.mrf.mxu0  ;;  %v1180_v2 = vpop.f32.mrf.mxu1  ;;  %6811 = vmatprep.subr.mxu0 %v7073_v0  ;;  %6818 = vmatprep.subr.mxu1 %v7073_v0 }
 0x106   :  { %6802 = vmatmul.mubr.msk.f32.vlgmr.msra.gmra.mxu0 %vm109_vm1, %v1110_v1  ;;  %6809 = vmatmul.mubr.msk.f32.vlgmr.msra.gmra.mxu1 %vm109_vm1, %v1180_v2  ;;  %v103_v1 = vmul.f32 %v7234_v50, %v7234_v50  ;;  %v127_v2 = vsel %vm109_vm1, %v102_v58, 0.0  ;;  %v7021_v50 = vld [vmem:[#allocation2 + $0x70] sm:$0xff] }
 0x107   :  { %v6523_v3 = vpop.f32.mrf.mxu0  ;;  %v6530_v4 = vpop.f32.mrf.mxu1  ;;  %6812 = vmatpush3.msra.mxu0 %v7626_v53  ;;  %6819 = vmatpush3.msra.mxu1 %v7626_v53 }
 0x108   :  { %6813 = vmatprep.subr.mxu0 %v7073_v0  ;;  %6820 = vmatprep.subr.mxu1 %v7073_v0  ;;  %v128_v3 = vadd.f32 %v127_v2, %v7305_v29  ;;  %v105_v4 = vmul.f32 %v7248_v56, %v7248_v56 }
 0x109   :  { %6814 = vmatpush3.msra.mxu0 %v7637_v60  ;;  %6815 = vmatprep.mubr.msk.f32.mxu0 %vm7074_vm0, %v7073_v0 }
 0x10a   :  { %6821 = vmatpush3.msra.mxu1 %v7637_v60  ;;  %6822 = vmatprep.mubr.msk.f32.mxu1 %vm7074_vm0, %v7073_v0 }
 0x10b   :  { %v1250_v6 = vpop.f32.mrf.mxu0  ;;  %v1320_v7 = vpop.f32.mrf.mxu1  ;;  %6825 = vmatprep.subr.mxu0 %v7073_v0  ;;  %6832 = vmatprep.subr.mxu1 %v7073_v0 }
 0x10c   :  { %6816 = vmatmul.mubr.msk.f32.vlgmr.msra.gmra.mxu0 %vm109_vm1, %v1250_v6  ;;  %6823 = vmatmul.mubr.msk.f32.vlgmr.msra.gmra.mxu1 %vm109_vm1, %v1320_v7  ;;  %v7019_v7 = vld [vmem:[#allocation2 + $0x68] sm:$0xff] }
 0x10d   :  { %v6537_v8 = vpop.f32.mrf.mxu0  ;;  %v6544_v9 = vpop.f32.mrf.mxu1  ;;  %6826 = vmatpush3.msra.mxu0 %v7626_v53  ;;  %6833 = vmatpush3.msra.mxu1 %v7626_v53 }
 0x10e   :  { %6827 = vmatprep.subr.mxu0 %v7073_v0  ;;  %6834 = vmatprep.subr.mxu1 %v7073_v0  ;;  %v7020_v8 = vld [vmem:[#allocation4 + $0x68] sm:$0xff] }
 0x10f   :  { %6828 = vmatpush3.msra.mxu0 %v7637_v60  ;;  %6829 = vmatprep.mubr.msk.f32.mxu0 %vm7074_vm0, %v7073_v0  ;;  %v90_v9 = vsub.f32 %v7019_v7, %v7020_v8 }
 0x110   :  { %6835 = vmatpush3.msra.mxu1 %v7637_v60  ;;  %6836 = vmatprep.mubr.msk.f32.mxu1 %vm7074_vm0, %v7073_v0 }
 0x111   :  { %v1390_v23 = vpop.f32.mrf.mxu0  ;;  %v1460_v24 = vpop.f32.mrf.mxu1  ;;  %6839 = vmatprep.subr.mxu0 %v7073_v0  ;;  %6846 = vmatprep.subr.mxu1 %v7073_v0 }
 0x112   :  { %6830 = vmatmul.mubr.msk.f32.vlgmr.msra.gmra.mxu0 %vm109_vm1, %v1390_v23  ;;  %6837 = vmatmul.mubr.msk.f32.vlgmr.msra.gmra.mxu1 %vm109_vm1, %v1460_v24  ;;  %v7022_v24 = vld [vmem:[#allocation4 + $0x70] sm:$0xff] }
 0x113   :  { %v6551_v32 = vpop.f32.mrf.mxu0  ;;  %v6558_v36 = vpop.f32.mrf.mxu1  ;;  %6840 = vmatpush3.msra.mxu0 %v7626_v53  ;;  %6847 = vmatpush3.msra.mxu1 %v7626_v53 }
 0x114   :  { %6841 = vmatprep.subr.mxu0 %v7073_v0  ;;  %6848 = vmatprep.subr.mxu1 %v7073_v0  ;;  %v91_v32 = vsub.f32 %v7021_v50, %v7022_v24  ;;  %v106_v36 = vmul.f32 %v90_v9, %v90_v9 }
 0x115   :  { %6842 = vmatpush3.msra.mxu0 %v7637_v60  ;;  %6843 = vmatprep.mubr.msk.f32.mxu0 %vm7074_vm0, %v7073_v0 }
 0x116   :  { %6849 = vmatpush3.msra.mxu1 %v7637_v60  ;;  %6850 = vmatprep.mubr.msk.f32.mxu1 %vm7074_vm0, %v7073_v0  ;;  %v135_v56 = vsel %vm109_vm1, %v106_v36, 0.0 }
 0x117   :  { %v1530_v59 = vpop.f32.mrf.mxu0  ;;  %v1600_v47 = vpop.f32.mrf.mxu1  ;;  %6853 = vmatprep.subr.mxu0 %v7073_v0  ;;  %6860 = vmatprep.subr.mxu1 %v7073_v0 }
 0x118   :  { %6844 = vmatmul.mubr.msk.f32.vlgmr.msra.gmra.mxu0 %vm109_vm1, %v1530_v59  ;;  %6851 = vmatmul.mubr.msk.f32.vlgmr.msra.gmra.mxu1 %vm109_vm1, %v1600_v47  ;;  %v7023_v47 = vld [vmem:[#allocation2 + $0x78] sm:$0xff] }
 0x119   :  { %v6565_v61 = vpop.f32.mrf.mxu0  ;;  %v6572_v62 = vpop.f32.mrf.mxu1  ;;  %6854 = vmatpush3.msra.mxu0 %v7626_v53  ;;  %6861 = vmatpush3.msra.mxu1 %v7626_v53 }
 0x11a   :  { %6855 = vmatprep.subr.mxu0 %v7073_v0  ;;  %6862 = vmatprep.subr.mxu1 %v7073_v0  ;;  %v7024_v61 = vld [vmem:[#allocation4 + $0x78] sm:$0xff]  ;;  %v107_v62 = vmul.f32 %v91_v32, %v91_v32 }
 0x11b   :  { %6856 = vmatpush3.msra.mxu0 %v7637_v60  ;;  %6857 = vmatprep.mubr.msk.f32.mxu0 %vm7074_vm0, %v7073_v0  ;;  %v92_v29 = vsub.f32 %v7023_v47, %v7024_v61 }
 0x11c   :  { %6863 = vmatpush3.msra.mxu1 %v7637_v60  ;;  %6864 = vmatprep.mubr.msk.f32.mxu1 %vm7074_vm0, %v7073_v0 }
 0x11d   :  { %v1670_v10 = vpop.f32.mrf.mxu0  ;;  %v1740_v12 = vpop.f32.mrf.mxu1  ;;  %6867 = vmatprep.subr.mxu0 %v7073_v0  ;;  %6874 = vmatprep.subr.mxu1 %v7073_v0 }
 0x11e   :  { %6858 = vmatmul.mubr.msk.f32.vlgmr.msra.gmra.mxu0 %vm109_vm1, %v1670_v10  ;;  %6865 = vmatmul.mubr.msk.f32.vlgmr.msra.gmra.mxu1 %vm109_vm1, %v1740_v12  ;;  %v108_v12 = vmul.f32 %v92_v29, %v92_v29 }
 0x11f   :  { %v6579_v13 = vpop.f32.mrf.mxu0  ;;  %v6586_v14 = vpop.f32.mrf.mxu1  ;;  %6868 = vmatpush3.msra.mxu0 %v7626_v53  ;;  %6875 = vmatpush3.msra.mxu1 %v7626_v53 }
 0x120   :  { %6869 = vmatprep.subr.mxu0 %v7073_v0  ;;  %6876 = vmatprep.subr.mxu1 %v7073_v0  ;;  %v137_v13 = vsel %vm109_vm1, %v107_v62, 0.0 }
 0x121   :  { %6870 = vmatpush3.msra.mxu0 %v7637_v60  ;;  %6871 = vmatprep.mubr.msk.f32.mxu0 %vm7074_vm0, %v7073_v0 }
 0x122   :  { %6877 = vmatpush3.msra.mxu1 %v7637_v60  ;;  %6878 = vmatprep.mubr.msk.f32.mxu1 %vm7074_vm0, %v7073_v0 }
 0x123   :  { %v1810_v18 = vpop.f32.mrf.mxu0  ;;  %v1880_v19 = vpop.f32.mrf.mxu1  ;;  %6881 = vmatprep.subr.mxu0 %v7073_v0  ;;  %6888 = vmatprep.subr.mxu1 %v7073_v0 }
 0x124   :  { %6872 = vmatmul.mubr.msk.f32.vlgmr.msra.gmra.mxu0 %vm109_vm1, %v1810_v18  ;;  %6879 = vmatmul.mubr.msk.f32.vlgmr.msra.gmra.mxu1 %vm109_vm1, %v1880_v19  ;;  %v139_v18 = vsel %vm109_vm1, %v108_v12, 0.0 }
 0x125   :  { %v6593_v28 = vpop.f32.mrf.mxu0  ;;  %v6600_v31 = vpop.f32.mrf.mxu1  ;;  %6882 = vmatpush3.msra.mxu0 %v7626_v53  ;;  %6889 = vmatpush3.msra.mxu1 %v7626_v53 }
 0x126   :  { %6883 = vmatprep.subr.mxu0 %v7073_v0  ;;  %6890 = vmatprep.subr.mxu1 %v7073_v0 }
 0x127   :  { %6884 = vmatpush3.msra.mxu0 %v7637_v60  ;;  %6885 = vmatprep.mubr.msk.f32.mxu0 %vm7074_vm0, %v7073_v0 }
 0x128   :  { %6891 = vmatpush3.msra.mxu1 %v7637_v60  ;;  %6892 = vmatprep.mubr.msk.f32.mxu1 %vm7074_vm0, %v7073_v0 }
 0x129   :  { %v1950_v39 = vpop.f32.mrf.mxu0  ;;  %v2020_v40 = vpop.f32.mrf.mxu1  ;;  %6895 = vmatprep.subr.mxu0 %v7073_v0  ;;  %6902 = vmatprep.subr.mxu1 %v7073_v0 }
 0x12a   :  { %6886 = vmatmul.mubr.msk.f32.vlgmr.msra.gmra.mxu0 %vm109_vm1, %v1950_v39  ;;  %6893 = vmatmul.mubr.msk.f32.vlgmr.msra.gmra.mxu1 %vm109_vm1, %v2020_v40 }
 0x12b   :  { %v6607_v45 = vpop.f32.mrf.mxu0  ;;  %v6614_v46 = vpop.f32.mrf.mxu1  ;;  %6896 = vmatpush3.msra.mxu0 %v7626_v53  ;;  %6903 = vmatpush3.msra.mxu1 %v7626_v53 }
 0x12c   :  { %6897 = vmatprep.subr.mxu0 %v7073_v0  ;;  %6904 = vmatprep.subr.mxu1 %v7073_v0 }
 0x12d   :  { %6898 = vmatpush3.msra.mxu0 %v7637_v60  ;;  %6899 = vmatprep.mubr.msk.f32.mxu0 %vm7074_vm0, %v7073_v0 }
 0x12e   :  { %6905 = vmatpush3.msra.mxu1 %v7637_v60  ;;  %6906 = vmatprep.mubr.msk.f32.mxu1 %vm7074_vm0, %v7073_v0 }
 0x12f   :  { %v2090_v63 = vpop.f32.mrf.mxu0  ;;  %v2160_v51 = vpop.f32.mrf.mxu1  ;;  %6909 = vmatprep.subr.mxu0 %v7073_v0  ;;  %6916 = vmatprep.subr.mxu1 %v7073_v0 }
 0x130   :  { %6900 = vmatmul.mubr.msk.f32.vlgmr.msra.gmra.mxu0 %vm109_vm1, %v2090_v63  ;;  %6907 = vmatmul.mubr.msk.f32.vlgmr.msra.gmra.mxu1 %vm109_vm1, %v2160_v51 }
 0x131   :  { %v6621_v11 = vpop.f32.mrf.mxu0  ;;  %v6628_v52 = vpop.f32.mrf.mxu1  ;;  %6910 = vmatpush3.msra.mxu0 %v7626_v53  ;;  %6917 = vmatpush3.msra.mxu1 %v7626_v53 }
 0x132   :  { %6911 = vmatprep.subr.mxu0 %v7073_v0  ;;  %6918 = vmatprep.subr.mxu1 %v7073_v0 }
 0x133   :  { %6912 = vmatpush3.msra.mxu0 %v7637_v60  ;;  %6913 = vmatprep.mubr.msk.f32.mxu0 %vm7074_vm0, %v7073_v0 }
 0x134   :  { %6919 = vmatpush3.msra.mxu1 %v7637_v60  ;;  %6920 = vmatprep.mubr.msk.f32.mxu1 %vm7074_vm0, %v7073_v0 }
 0x135   :  { %v2230_v5 = vpop.f32.mrf.mxu0  ;;  %v2300_v15 = vpop.f32.mrf.mxu1  ;;  %6923 = vmatprep.subr.mxu0 %v7073_v0  ;;  %6930 = vmatprep.subr.mxu1 %v7073_v0 }
 0x136   :  { %6914 = vmatmul.mubr.msk.f32.vlgmr.msra.gmra.mxu0 %vm109_vm1, %v2230_v5  ;;  %6921 = vmatmul.mubr.msk.f32.vlgmr.msra.gmra.mxu1 %vm109_vm1, %v2300_v15 }
 0x137   :  { %v6635_v16 = vpop.f32.mrf.mxu0  ;;  %v6642_v17 = vpop.f32.mrf.mxu1  ;;  %6924 = vmatpush3.msra.mxu0 %v7626_v53  ;;  %6931 = vmatpush3.msra.mxu1 %v7626_v53 }
 0x138   :  { %6925 = vmatprep.subr.mxu0 %v7073_v0  ;;  %6932 = vmatprep.subr.mxu1 %v7073_v0 }
 0x139   :  { %6926 = vmatpush3.msra.mxu0 %v7637_v60  ;;  %6927 = vmatprep.mubr.msk.f32.mxu0 %vm7074_vm0, %v7073_v0 }
 0x13a   :  { %6933 = vmatpush3.msra.mxu1 %v7637_v60  ;;  %6934 = vmatprep.mubr.msk.f32.mxu1 %vm7074_vm0, %v7073_v0 }
 0x13b   :  { %v2370_v20 = vpop.f32.mrf.mxu0  ;;  %v2440_v21 = vpop.f32.mrf.mxu1  ;;  %6937 = vmatprep.subr.mxu0 %v7073_v0  ;;  %6944 = vmatprep.subr.mxu1 %v7073_v0 }
 0x13c   :  { %6928 = vmatmul.mubr.msk.f32.vlgmr.msra.gmra.mxu0 %vm109_vm1, %v2370_v20  ;;  %6935 = vmatmul.mubr.msk.f32.vlgmr.msra.gmra.mxu1 %vm109_vm1, %v2440_v21 }
 0x13d   :  { %v6649_v22 = vpop.f32.mrf.mxu0  ;;  %v6656_v25 = vpop.f32.mrf.mxu1  ;;  %6938 = vmatpush3.msra.mxu0 %v7626_v53  ;;  %6945 = vmatpush3.msra.mxu1 %v7626_v53 }
 0x13e   :  { %6939 = vmatprep.subr.mxu0 %v7073_v0  ;;  %6946 = vmatprep.subr.mxu1 %v7073_v0 }
 0x13f   :  { %6940 = vmatpush3.msra.mxu0 %v7637_v60  ;;  %6941 = vmatprep.mubr.msk.f32.mxu0 %vm7074_vm0, %v7073_v0 }
 0x140   :  { %6947 = vmatpush3.msra.mxu1 %v7637_v60  ;;  %6948 = vmatprep.mubr.msk.f32.mxu1 %vm7074_vm0, %v7073_v0 }
 0x141   :  { %v2510_v26 = vpop.f32.mrf.mxu0  ;;  %v2580_v27 = vpop.f32.mrf.mxu1  ;;  %6951 = vmatprep.subr.mxu0 %v7073_v0  ;;  %6958 = vmatprep.subr.mxu1 %v7073_v0 }
 0x142   :  { %6942 = vmatmul.mubr.msk.f32.vlgmr.msra.gmra.mxu0 %vm109_vm1, %v2510_v26  ;;  %6949 = vmatmul.mubr.msk.f32.vlgmr.msra.gmra.mxu1 %vm109_vm1, %v2580_v27 }
 0x143   :  { %v6663_v30 = vpop.f32.mrf.mxu0  ;;  %v6670_v33 = vpop.f32.mrf.mxu1  ;;  %6952 = vmatpush3.msra.mxu0 %v7626_v53  ;;  %6959 = vmatpush3.msra.mxu1 %v7626_v53 }
 0x144   :  { %6953 = vmatprep.subr.mxu0 %v7073_v0  ;;  %6960 = vmatprep.subr.mxu1 %v7073_v0 }
 0x145   :  { %6954 = vmatpush3.msra.mxu0 %v7637_v60  ;;  %6955 = vmatprep.mubr.msk.f32.mxu0 %vm7074_vm0, %v7073_v0 }
 0x146   :  { %6961 = vmatpush3.msra.mxu1 %v7637_v60  ;;  %6962 = vmatprep.mubr.msk.f32.mxu1 %vm7074_vm0, %v7073_v0 }
 0x147   :  { %v2650_v34 = vpop.f32.mrf.mxu0  ;;  %v2720_v35 = vpop.f32.mrf.mxu1  ;;  %6965 = vmatprep.subr.mxu0 %v7073_v0  ;;  %6972 = vmatprep.subr.mxu1 %v7073_v0 }
 0x148   :  { %6956 = vmatmul.mubr.msk.f32.vlgmr.msra.gmra.mxu0 %vm109_vm1, %v2650_v34  ;;  %6963 = vmatmul.mubr.msk.f32.vlgmr.msra.gmra.mxu1 %vm109_vm1, %v2720_v35 }
 0x149   :  { %v6677_v37 = vpop.f32.mrf.mxu0  ;;  %v6684_v38 = vpop.f32.mrf.mxu1  ;;  %6966 = vmatpush3.msra.mxu0 %v7626_v53  ;;  %6973 = vmatpush3.msra.mxu1 %v7626_v53 }
 0x14a   :  { %6967 = vmatprep.subr.mxu0 %v7073_v0  ;;  %6974 = vmatprep.subr.mxu1 %v7073_v0 }
 0x14b   :  { %6968 = vmatpush3.msra.mxu0 %v7637_v60  ;;  %6969 = vmatprep.mubr.msk.f32.mxu0 %vm7074_vm0, %v7073_v0 }
 0x14c   :  { %6975 = vmatpush3.msra.mxu1 %v7637_v60  ;;  %6976 = vmatprep.mubr.msk.f32.mxu1 %vm7074_vm0, %v7073_v0 }
 0x14d   :  { %v2790_v41 = vpop.f32.mrf.mxu0  ;;  %v2860_v42 = vpop.f32.mrf.mxu1  ;;  %6979 = vmatprep.subr.mxu0 %v7073_v0  ;;  %6986 = vmatprep.subr.mxu1 %v7073_v0 }
 0x14e   :  { %6970 = vmatmul.mubr.msk.f32.vlgmr.msra.gmra.mxu0 %vm109_vm1, %v2790_v41  ;;  %6977 = vmatmul.mubr.msk.f32.vlgmr.msra.gmra.mxu1 %vm109_vm1, %v2860_v42 }
 0x14f   :  { %v6691_v48 = vpop.f32.mrf.mxu0  ;;  %v6698_v49 = vpop.f32.mrf.mxu1  ;;  %6980 = vmatpush3.msra.mxu0 %v7626_v53  ;;  %6987 = vmatpush3.msra.mxu1 %v7626_v53 }
 0x150   :  { %6981 = vmatprep.subr.mxu0 %v7073_v0  ;;  %6988 = vmatprep.subr.mxu1 %v7073_v0 }
 0x151   :  { %6982 = vmatpush3.msra.mxu0 %v7637_v60  ;;  %6983 = vmatprep.mubr.msk.f32.mxu0 %vm7074_vm0, %v7073_v0 }
 0x152   :  { %6989 = vmatpush3.msra.mxu1 %v7637_v60  ;;  %6990 = vmatprep.mubr.msk.f32.mxu1 %vm7074_vm0, %v7073_v0  ;;  %v104_v60 = vmul.f32 %v7219_v44, %v7219_v44  ;;  %v129_v0 = vsel %vm109_vm1, %v103_v1, 0.0  ;;  %v133_v44 = vsel %vm109_vm1, %v105_v4, 0.0 }
 0x153   :  { %v2930_v54 = vpop.f32.mrf.mxu0  ;;  %v3000_v55 = vpop.f32.mrf.mxu1  ;;  %v130_v6 = vadd.f32 %v129_v0, %v128_v3 }
 0x154   :  { %6984 = vmatmul.mubr.msk.f32.vlgmr.msra.gmra.mxu0 %vm109_vm1, %v2930_v54  ;;  %6991 = vmatmul.mubr.msk.f32.vlgmr.msra.gmra.mxu1 %vm109_vm1, %v3000_v55  ;;  %v131_v43 = vsel %vm109_vm1, %v104_v60, 0.0 }
 0x155   :  { %v6705_v53 = vpop.f32.mrf.mxu0  ;;  %v6712_v57 = vpop.f32.mrf.mxu1  ;;  %v132_v23 = vadd.f32 %v131_v43, %v130_v6 }
 0x157   :  { %v134_v59 = vadd.f32 %v133_v44, %v132_v23 }
 0x159   :  { %v136_v10 = vadd.f32 %v135_v56, %v134_v59 }
 0x15b   :  { %v138_v14 = vadd.f32 %v137_v13, %v136_v10 }
 0x15d   :  { %v140_v19 = vadd.f32 %v139_v18, %v138_v14 }
 0x15f   :  { %141 = vadd.xlane.f32.xlu0 %v140_v19 }
 0x1a2   :  { %v3073_v28 = vpop.f32.mrf.mxu0  ;;  %v3146_v31 = vpop.f32.mrf.mxu1 }
 0x1a3   :  { %v5924_v22 = vmul.f32 %v3073_v28, %v3073_v28  ;;  %v5925_v25 = vmul.f32 %v3146_v31, %v3146_v31 }
 0x1a4   :  { %v6719_v39 = vpop.f32.mrf.mxu0  ;;  %v6726_v40 = vpop.f32.mrf.mxu1 }
 0x1a8   :  { %v7933_v45 = vpop.f32.mrf.mxu0  ;;  %v7935_v46 = vpop.f32.mrf.mxu1 }
 0x1aa   :  { %v6733_v63 = vpop.f32.mrf.mxu0  ;;  %v6740_v51 = vpop.f32.mrf.mxu1 }
 0x1ae   :  { %v7937_v11 = vpop.f32.mrf.mxu0  ;;  %v7939_v52 = vpop.f32.mrf.mxu1 }
 0x1b0   :  { %v6747_v5 = vpop.f32.mrf.mxu0  ;;  %v6754_v15 = vpop.f32.mrf.mxu1 }
 0x1b4   :  { %v7941_v16 = vpop.f32.mrf.mxu0  ;;  %v7943_v17 = vpop.f32.mrf.mxu1 }
 0x1b6   :  { %v6761_v20 = vpop.f32.mrf.mxu0  ;;  %v6768_v21 = vpop.f32.mrf.mxu1 }
 0x1ba   :  { %v3657_v26 = vpop.f32.mrf.mxu0  ;;  %v3730_v27 = vpop.f32.mrf.mxu1 }
 0x1bb   :  { %v5932_v30 = vmul.f32 %v3657_v26, %v3657_v26  ;;  %v7945_v33 = vmul.f32 %v3657_v26, %v3073_v28  ;;  %v5933_v34 = vmul.f32 %v3730_v27, %v3730_v27  ;;  %v7947_v35 = vmul.f32 %v3730_v27, %v3146_v31 }
 0x1bc   :  { %v6775_v37 = vpop.f32.mrf.mxu0  ;;  %v6782_v38 = vpop.f32.mrf.mxu1 }
 0x1bd   :  { %v6012_v41 = vadd.f32 %v5932_v30, %v5924_v22  ;;  %v6013_v42 = vadd.f32 %v5933_v34, %v5925_v25 }
 0x1bf   :  { %v6020_v20 = vadd.f32 0.0001, %v6012_v41  ;;  %v6021_v21 = vadd.f32 0.0001, %v6013_v42 }
 0x1c0   :  { %v3803_v48 = vpop.f32.mrf.mxu0  ;;  %v3876_v49 = vpop.f32.mrf.mxu1 }
 0x1c1   :  { %v7950_v54 = vmul.f32 %v3803_v48, %v7933_v45  ;;  %v7953_v55 = vmul.f32 %v3876_v49, %v7935_v46  ;;  %v5934_v37 = vmul.f32 %v3803_v48, %v3803_v48 }
 0x1c2   :  { %v6789_v53 = vpop.f32.mrf.mxu0  ;;  %v6796_v57 = vpop.f32.mrf.mxu1 }
 0x1c3   :  { %v5935_v57 = vmul.f32 %v3876_v49, %v3876_v49  ;;  %v5928_v49 = vmul.f32 %v7937_v11, %v7937_v11 }
 0x1c6   :  { %v3949_v58 = vpop.f32.mrf.mxu0  ;;  %v4022_v1 = vpop.f32.mrf.mxu1 }
 0x1c7   :  { %v7956_v2 = vmul.f32 %v3949_v58, %v7937_v11  ;;  %v7959_v60 = vmul.f32 %v4022_v1, %v7939_v52  ;;  %v5936_v42 = vmul.f32 %v3949_v58, %v3949_v58  ;;  %v5930_v58 = vmul.f32 %v7941_v16, %v7941_v16 }
 0x1c8   :  { %v6803_v0 = vpop.f32.mrf.mxu0  ;;  %v6810_v3 = vpop.f32.mrf.mxu1 }
 0x1cc   :  { %v7961_v4 = vpop.f32.mrf.mxu0  ;;  %v7963_v6 = vpop.f32.mrf.mxu1 }
 0x1cd   :  { %v7967_v7 = vmul.f32 %v7961_v4, %v7941_v16  ;;  %v7971_v8 = vmul.f32 %v7963_v6, %v7943_v17  ;;  %v5938_v11 = vmul.f32 %v7961_v4, %v7961_v4  ;;  %v6016_v16 = vadd.f32 %v5936_v42, %v5928_v49 }
 0x1ce   :  { %v6817_v9 = vpop.f32.mrf.mxu0  ;;  %v6824_v43 = vpop.f32.mrf.mxu1 }
 0x1cf   :  { %v5927_v9 = vmul.f32 %v7935_v46, %v7935_v46 }
 0x1d2   :  { %v4241_v23 = vpop.f32.mrf.mxu0  ;;  %v4314_v50 = vpop.f32.mrf.mxu1 }
 0x1d3   :  { %v5948_v28 = vsub.f32 %v4241_v23, %v5924_v22  ;;  %v5949_v31 = vsub.f32 %v4314_v50, %v5925_v25  ;;  %v5926_v22 = vmul.f32 %v7933_v45, %v7933_v45  ;;  %v5937_v50 = vmul.f32 %v4022_v1, %v4022_v1 }
 0x1d4   :  { %v6831_v24 = vpop.f32.mrf.mxu0  ;;  %v6838_v32 = vpop.f32.mrf.mxu1  ;;  %v5929_v45 = vmul.f32 %v7939_v52, %v7939_v52 }
 0x1d8   :  { %v4387_v36 = vpop.f32.mrf.mxu0  ;;  %v4460_v44 = vpop.f32.mrf.mxu1 }
 0x1d9   :  { %v5950_v41 = vsub.f32 %v4387_v36, %v5926_v22  ;;  %v5951_v23 = vsub.f32 %v4460_v44, %v5927_v9 }
 0x1da   :  { %v6845_v59 = vpop.f32.mrf.mxu0  ;;  %v6852_v47 = vpop.f32.mrf.mxu1 }
 0x1de   :  { %v4533_v61 = vpop.f32.mrf.mxu0  ;;  %v4606_v29 = vpop.f32.mrf.mxu1 }
 0x1df   :  { %v5952_v36 = vsub.f32 %v4533_v61, %v5928_v49  ;;  %v5953_v1 = vsub.f32 %v4606_v29, %v5929_v45 }
 0x1e0   :  { %v6859_v62 = vpop.f32.mrf.mxu0  ;;  %v6866_v56 = vpop.f32.mrf.mxu1 }
 0x1e1   :  { %v6014_v62 = vadd.f32 %v5934_v37, %v5926_v22 }
 0x1e3   :  { %v6022_v52 = vadd.f32 0.0001, %v6014_v62 }
 0x1e4   :  { %v7973_v10 = vpop.f32.mrf.mxu0  ;;  %v7975_v12 = vpop.f32.mrf.mxu1 }
 0x1e6   :  { %v6873_v13 = vpop.f32.mrf.mxu0  ;;  %v6880_v14 = vpop.f32.mrf.mxu1 }
 0x1e7   :  { %v6015_v14 = vadd.f32 %v5935_v57, %v5927_v9 }
 0x1ea   :  { %v4825_v18 = vpop.f32.mrf.mxu0  ;;  %v4898_v19 = vpop.f32.mrf.mxu1 }
 0x1eb   :  { %v5956_v39 = vsub.f32 %v4825_v18, %v5932_v30  ;;  %v5957_v40 = vsub.f32 %v4898_v19, %v5933_v34  ;;  %v5931_v18 = vmul.f32 %v7943_v17, %v7943_v17  ;;  %v5954_v17 = vsub.f32 %v7973_v10, %v5930_v58 }
 0x1ec   :  { %v6887_v63 = vpop.f32.mrf.mxu0  ;;  %v6894_v51 = vpop.f32.mrf.mxu1 }
 0x1ed   :  { %v6028_v5 = vadd.f32 %v5956_v39, %v5948_v28  ;;  %v6029_v15 = vadd.f32 %v5957_v40, %v5949_v31  ;;  %v5939_v31 = vmul.f32 %v7963_v6, %v7963_v6  ;;  %v6023_v63 = vadd.f32 0.0001, %v6015_v14 }
 0x1ee   :  { %v6017_v51 = vadd.f32 %v5937_v50, %v5929_v45 }
 0x1ef   :  { %v6036_v26 = vadd.f32 0.0009, %v6028_v5  ;;  %v6037_v27 = vadd.f32 0.0009, %v6029_v15 }
 0x1f0   :  { %v4971_v38 = vpop.f32.mrf.mxu0  ;;  %v5044_v53 = vpop.f32.mrf.mxu1 }
 0x1f1   :  { %v6044_v0 = vmul.f32 %v6036_v26, %v6020_v20  ;;  %v6045_v3 = vmul.f32 %v6037_v27, %v6021_v21  ;;  %v5958_v25 = vsub.f32 %v4971_v38, %v5934_v37  ;;  %v5959_v43 = vsub.f32 %v5044_v53, %v5935_v57 }
 0x1f2   :  { %v6901_v30 = vpop.f32.mrf.mxu0  ;;  %v6908_v34 = vpop.f32.mrf.mxu1  ;;  %v5955_v27 = vsub.f32 %v7975_v12, %v5931_v18  ;;  %v5972_v38 = vmul.f32 2.0, %v7945_v33  ;;  %v5973_v53 = vmul.f32 2.0, %v7947_v35  ;;  %v6024_v57 = vadd.f32 0.0001, %v6016_v16 }
 0x1f3   :  { %v6030_v48 = vadd.f32 %v5958_v25, %v5950_v41  ;;  %v6031_v59 = vadd.f32 %v5959_v43, %v5951_v23  ;;  %7003 = vrcp.f32 %v6044_v0  ;;  %v6025_v0 = vadd.f32 0.0001, %v6017_v51 }
 0x1f4   :  { %7005 = vrcp.f32 %v6045_v3  ;;  %v6018_v3 = vadd.f32 %v5938_v11, %v5930_v58  ;;  %v6019_v12 = vadd.f32 %v5939_v31, %v5931_v18 }
 0x1f5   :  { %v6038_v44 = vadd.f32 0.0009, %v6030_v48  ;;  %v6039_v19 = vadd.f32 0.0009, %v6031_v59 }
 0x1f6   :  { %v5117_v24 = vpop.f32.mrf.mxu0  ;;  %v5190_v32 = vpop.f32.mrf.mxu1  ;;  %v6026_v49 = vadd.f32 0.0001, %v6018_v3 }
 0x1f7   :  { %v5960_v47 = vsub.f32 %v5117_v24, %v5936_v42  ;;  %v5961_v56 = vsub.f32 %v5190_v32, %v5937_v50  ;;  %v6046_v5 = vmul.f32 %v6038_v44, %v6022_v52  ;;  %v6047_v21 = vmul.f32 %v6039_v19, %v6023_v63 }
 0x1f8   :  { %v6915_v13 = vpop.f32.mrf.mxu0  ;;  %v6922_v46 = vpop.f32.mrf.mxu1  ;;  %v5980_v50 = vadd.f32 0.0001, %v5972_v38  ;;  %v5981_v32 = vadd.f32 0.0001, %v5973_v53 }
 0x1f9   :  { %v6032_v28 = vadd.f32 %v5960_v47, %v5952_v36  ;;  %v6033_v39 = vadd.f32 %v5961_v56, %v5953_v1  ;;  %7007 = vrcp.f32 %v6046_v5  ;;  %v5974_v47 = vmul.f32 2.0, %v7950_v54 }
 0x1fa   :  { %7009 = vrcp.f32 %v6047_v21  ;;  %v6027_v56 = vadd.f32 0.0001, %v6019_v12 }
 0x1fb   :  { %v6040_v26 = vadd.f32 0.0009, %v6032_v28  ;;  %v6041_v6 = vadd.f32 0.0009, %v6033_v39 }
 0x1fc   :  { %v5263_v61 = vpop.f32.mrf.mxu0  ;;  %v5336_v40 = vpop.f32.mrf.mxu1 }
 0x1fd   :  { %v5962_v29 = vsub.f32 %v5263_v61, %v5938_v11  ;;  %v5963_v15 = vsub.f32 %v5336_v40, %v5939_v31  ;;  %v6048_v30 = vmul.f32 %v6040_v26, %v6024_v57  ;;  %v6049_v43 = vmul.f32 %v6041_v6, %v6025_v0 }
 0x1fe   :  { %v6929_v4 = vpop.f32.mrf.mxu0  ;;  %v6936_v20 = vpop.f32.mrf.mxu1  ;;  %v5982_v40 = vadd.f32 0.0001, %v5974_v47 }
 0x1ff   :  { %v6034_v37 = vadd.f32 %v5962_v29, %v5954_v17  ;;  %v6035_v22 = vadd.f32 %v5963_v15, %v5955_v27  ;;  %7011 = vrcp.f32 %v6048_v30  ;;  %v5977_v17 = vmul.f32 2.0, %v7959_v60 }
 0x200   :  { %7013 = vrcp.f32 %v6049_v43  ;;  %v7004_v14 = vpop.eup %7003  ;;  %v5978_v43 = vmul.f32 2.0, %v7967_v7 }
 0x201   :  { %v6042_v41 = vadd.f32 0.0009, %v6034_v37  ;;  %v6043_v59 = vadd.f32 0.0009, %v6035_v22  ;;  %v7006_v18 = vpop.eup %7005 }
 0x202   :  { %v5409_v10 = vpop.f32.mrf.mxu0  ;;  %v5482_v25 = vpop.f32.mrf.mxu1 }
 0x203   :  { %v5964_v34 = vsub.f32 %v5409_v10, %v7945_v33  ;;  %v5965_v9 = vsub.f32 %v5482_v25, %v7947_v35  ;;  %v5975_v33 = vmul.f32 2.0, %v7953_v55  ;;  %v6050_v35 = vmul.f32 %v6042_v41, %v6026_v49 }
 0x204   :  { %v6943_v42 = vpop.f32.mrf.mxu0  ;;  %v6950_v23 = vpop.f32.mrf.mxu1  ;;  %v6051_v11 = vmul.f32 %v6043_v59, %v6027_v56  ;;  %v5985_v25 = vadd.f32 0.0001, %v5977_v17 }
 0x205   :  { %v5988_v48 = vmul.f32 2.0, %v5964_v34  ;;  %v5989_v24 = vmul.f32 2.0, %v5965_v9  ;;  %v5983_v63 = vadd.f32 0.0001, %v5975_v33  ;;  %7015 = vrcp.f32 %v6050_v35 }
 0x206   :  { %7017 = vrcp.f32 %v6051_v11  ;;  %v7008_v20 = vpop.eup %7007 }
 0x207   :  { %v5996_v45 = vadd.f32 0.0009, %v5988_v48  ;;  %v5997_v62 = vadd.f32 0.0009, %v5989_v24  ;;  %v7010_v37 = vpop.eup %7009 }
 0x208   :  { %v5555_v13 = vpop.f32.mrf.mxu0  ;;  %v5628_v46 = vpop.f32.mrf.mxu1 }
 0x209   :  { %v6004_v36 = vmul.f32 %v5996_v45, %v5980_v50  ;;  %v6005_v58 = vmul.f32 %v5997_v62, %v5981_v32  ;;  %v5966_v1 = vsub.f32 %v5555_v13, %v7950_v54  ;;  %v5967_v44 = vsub.f32 %v5628_v46, %v7953_v55 }
 0x20a   :  { %v6957_v19 = vpop.f32.mrf.mxu0  ;;  %v6964_v28 = vpop.f32.mrf.mxu1  ;;  %v5976_v55 = vmul.f32 2.0, %v7956_v2  ;;  %v5986_v13 = vadd.f32 0.0001, %v5978_v43 }
 0x20b   :  { %v6060_v52 = vmul.f32 %v7004_v14, %v6004_v36  ;;  %v6061_v31 = vmul.f32 %v7006_v18, %v6005_v58  ;;  %v5990_v39 = vmul.f32 2.0, %v5966_v1  ;;  %v5991_v61 = vmul.f32 2.0, %v5967_v44 }
 0x20c   :  { %v5984_v10 = vadd.f32 0.0001, %v5976_v55  ;;  %v7012_v12 = vpop.eup %7011 }
 0x20d   :  { %v6069_v16 = vsel %vm6068_vm2, %v6060_v52, 0.0  ;;  %v6070_v29 = vsel %vm6068_vm2, %v6061_v31, 0.0  ;;  %v5998_v51 = vadd.f32 0.0009, %v5990_v39  ;;  %v5999_v54 = vadd.f32 0.0009, %v5991_v61  ;;  %v7014_v50 = vpop.eup %7013 }
 0x20e   :  { %v6071_v5 = vadd.f32 %v6070_v29, %v6069_v16  ;;  %v5701_v15 = vpop.f32.mrf.mxu0  ;;  %v5774_v4 = vpop.f32.mrf.mxu1 }
 0x20f   :  { %v6006_v21 = vmul.f32 %v5998_v51, %v5982_v40  ;;  %v6007_v26 = vmul.f32 %v5999_v54, %v5983_v63  ;;  %v5968_v27 = vsub.f32 %v5701_v15, %v7956_v2  ;;  %v5969_v6 = vsub.f32 %v5774_v4, %v7959_v60  ;;  %v142_v63 = vpop.xlane.xlu0 %141 }
 0x210   :  { %v6971_v38 = vpop.f32.mrf.mxu0  ;;  %v6978_v53 = vpop.f32.mrf.mxu1  ;;  %v5979_v2 = vmul.f32 2.0, %v7971_v8  ;;  %v143_v16 = vrot.slane %v142_v63, 4 }
 0x211   :  { %v6062_v57 = vmul.f32 %v7008_v20, %v6006_v21  ;;  %v6063_v0 = vmul.f32 %v7010_v37, %v6007_v26  ;;  %v5992_v3 = vmul.f32 2.0, %v5968_v27  ;;  %v5993_v22 = vmul.f32 2.0, %v5969_v6 }
 0x212   :  { %v5987_v46 = vadd.f32 0.0001, %v5979_v2  ;;  %v7016_v14 = vpop.eup %7015  ;;  %v144_v29 = vadd.f32 %v143_v16, %v142_v63  ;;  %v6093_v6 = vlaneseq }
 0x213   :  { %v6072_v30 = vsel %vm6068_vm2, %v6062_v57, 0.0  ;;  %v6000_v34 = vadd.f32 0.0009, %v5992_v3  ;;  %v6001_v9 = vadd.f32 0.0009, %v5993_v22  ;;  %v6074_v60 = vsel %vm6068_vm2, %v6063_v0, 0.0  ;;  %v7018_v18 = vpop.eup %7017 }
 0x214   :  { %v6073_v41 = vadd.f32 %v6072_v30, %v6071_v5  ;;  %v5847_v42 = vpop.f32.mrf.mxu0  ;;  %v5920_v23 = vpop.f32.mrf.mxu1  ;;  %v145_v51 = vrot.slane %v144_v29, 2  ;;  %v6094_v37 = vshrl.u32 %v6093_v6, 7  ;;  %v6096_v38 = vand.u32 127, %v6093_v6 }
 0x215   :  { %v6008_v48 = vmul.f32 %v6000_v34, %v5984_v10  ;;  %v6009_v24 = vmul.f32 %v6001_v9, %v5985_v25  ;;  %v5970_v32 = vsub.f32 %v5847_v42, %v7967_v7  ;;  %v5971_v49 = vsub.f32 %v5920_v23, %v7971_v8 }
 0x216   :  { %v6075_v59 = vadd.f32 %v6074_v60, %v6073_v41  ;;  %v6985_v47 = vpop.f32.mrf.mxu0  ;;  %v6992_v45 = vpop.f32.mrf.mxu1  ;;  %v146_v54 = vadd.f32 %v145_v51, %v144_v29  ;;  %vm6097_vm3 = vcmp.eq.s32.totalorder %v6094_v37, 0  ;;  %vm6100_vm4 = vcmp.eq.s32.totalorder %v6096_v38, 1 }
 0x217   :  { %v6064_v62 = vmul.f32 %v7012_v12, %v6008_v48  ;;  %v6065_v33 = vmul.f32 %v7014_v50, %v6009_v24  ;;  %v5994_v56 = vmul.f32 2.0, %v5970_v32  ;;  %v5995_v35 = vmul.f32 2.0, %v5971_v49  ;;  %vm6101_vm6 = vmand %vm6097_vm3, %vm6100_vm4 }
 0x218   :  { %v147_v55 = vrot.slane %v146_v54, 1  ;;  %vm6098_vm5 = vcmp.eq.s32.totalorder %v6096_v38, 0 }
 0x219   :  { %v6076_v36 = vsel %vm6068_vm2, %v6064_v62, 0.0  ;;  %v6002_v58 = vadd.f32 0.0009, %v5994_v56  ;;  %v6003_v1 = vadd.f32 0.0009, %v5995_v35  ;;  %v6078_v8 = vsel %vm6068_vm2, %v6065_v33, 0.0  ;;  %vm6099_vm7 = vmand %vm6097_vm3, %vm6098_vm5 }
 0x21a   :  { %v6077_v44 = vadd.f32 %v6076_v36, %v6075_v59  ;;  %v148_v17 = vadd.f32 %v147_v55, %v146_v54 }
 0x21b   :  { %v6010_v11 = vmul.f32 %v6002_v58, %v5986_v13  ;;  %v6011_v7 = vmul.f32 %v6003_v1, %v5987_v46 }
 0x21c   :  { %v6079_v19 = vadd.f32 %v6078_v8, %v6077_v44  ;;  %6993 = vpush %v148_v17 }
 0x21d   :  { %v6066_v28 = vmul.f32 %v7016_v14, %v6010_v11  ;;  %v6067_v52 = vmul.f32 %v7018_v18, %v6011_v7 }
 0x21f   :  { %v6080_v31 = vsel %vm6068_vm2, %v6066_v28, 0.0  ;;  %v6082_v61 = vsel %vm6068_vm2, %v6067_v52, 0.0 }
 0x220   :  { %v6081_v39 = vadd.f32 %v6080_v31, %v6079_v19 }
 0x222   :  { %v6083_v40 = vadd.f32 %v6082_v61, %v6081_v39 }
 0x224   :  { %6084 = vadd.xlane.f32.xlu0 %v6083_v40 }
 0x24d   :  { %s6994_s3 = spop %6993 }
 0x24e   :  { %v6104_v57 = vstv %s6994_s3 }
 0x2ad   :  { %v6085_v5 = vpop.xlane.xlu0 %6084 }
 0x2ae   :  { %v6086_v15 = vrot.slane %v6085_v5, 4 }
 0x2b0   :  { %v6087_v4 = vadd.f32 %v6086_v15, %v6085_v5 }
 0x2b2   :  { %v6088_v20 = vrot.slane %v6087_v4, 2 }
 0x2b4   :  { %v6089_v21 = vadd.f32 %v6088_v20, %v6087_v4 }
 0x2b6   :  { %v6090_v26 = vrot.slane %v6089_v21, 1 }
 0x2b8   :  { %v6091_v27 = vadd.f32 %v6090_v26, %v6089_v21 }
 0x2ba   :  { %6995 = vpush %v6091_v27 }
 0x2eb   :  { %s6996_s30 = spop %6995 }
 0x2ec   :  { %v6102_v53 = vstv %s6996_s30 }
 0x2ed   :  { %v6103_v0 = vsel %vm6101_vm6, %v6102_v53, 0.0 }
 0x2ee   :  { %v6105_v3 = vsel %vm6099_vm7, %v6104_v57, %v6103_v0 }
 0x2ef   :  { %6106 = vst [vmem:[%s8026_s4] sm:$0xff] %v6105_v3 }
 0x2f0   :  { %6111 = vsyncpa [#allocation3], 1 }
 0x2f1   :  { %6112 = vsyncpa [#allocation5], 1 }

</bundles_post_ra>
